<compile_context>
chip_gen: v5e
topology: v5e:2x2
jax: 0.10.0
libtpu: 0.0.40
codegen_flags: <defaults>
</compile_context>

<pallas_src>
import jax
import jax.numpy as jnp
import numpy as np
from jax import lax
from jax.experimental import pallas as pl
from jax.experimental.pallas import tpu as pltpu


# ----------------------------- small utilities ----------------------------- #
def _vmem_limit_bytes():
    """Scoped-VMEM budget: ~75% of physical VMEM (96 MiB v5e/v6e, ~48 MiB v7x)."""
    try:
        cap = int(pltpu.get_tpu_info().vmem_capacity_bytes)
    except Exception:
        cap = 64 * 1024 * 1024
    return max(32 * 1024 * 1024, (cap * 3) // 4)


def _round_up(x, m):
    return -(-x // m) * m


# ----------------------------- shared GRU math ----------------------------- #
def _gru_update(gi, gh, h):
    """PyTorch GRU cell update from precomputed gate projections.

    gi = x @ W_ih + b_ih, gh = h @ W_hh + b_hh; gate order along 3H is [r|z|n].
    """
    H = h.shape[-1]
    r = jax.nn.sigmoid(gi[..., :H] + gh[..., :H])
    z = jax.nn.sigmoid(gi[..., H:2 * H] + gh[..., H:2 * H])
    n = jnp.tanh(gi[..., 2 * H:] + r * gh[..., 2 * H:])
    return (1.0 - z) * n + z * h


# ------------------ Kernel 1: sequential GRU (time in-kernel) -------------- #
def gru_seq_kernel(gi_ref, w_hh_ref, b_hh_ref, out_ref, h_scr):
    # gi_ref: (TC, bt, 3H) one time-chunk of precomputed input projections
    # out_ref: (TC, bt, H) hidden states for this chunk
    # h_scr: (bt, H) fp32 hidden state carried across time chunks (grid axis 1)
    @pl.when(pl.program_id(1) == 0)
    def _():
        h_scr[...] = jnp.zeros_like(h_scr)

    tc = gi_ref.shape[0]
    w_hh = w_hh_ref[...]
    b_hh = b_hh_ref[...]

    def step(t, h):
        gi = gi_ref[t]                                                  # (bt, 3H)
        # Recurrence kept fp32: bf16 rounding here would compound over T.
        gh = jnp.dot(h, w_hh, preferred_element_type=jnp.float32) + b_hh
        h_new = _gru_update(gi, gh, h)
        out_ref[t] = h_new
        return h_new

    # Full unroll for short chunks; partial unroll keeps LLO visibility for long T.
    h_final = lax.fori_loop(0, tc, step, h_scr[...],
                            unroll=(True if tc <= 16 else 8))
    h_scr[...] = h_final


def _choose_seq_tiles(T, B, H, budget_bytes):
    """Largest (time_chunk, batch_tile) whose double-buffered blocks fit VMEM.

    Prefers the full batch (fills the MXU M dim, grid of 1-2 steps) and full
    time; falls back to time-chunking (v7x 64 MiB VMEM), then batch tiling.
    """
    weight_bytes = 2 * (H * 3 * H + 3 * H) * 4
    def block_bytes(tc, bt):
        # gi (tc,bt,3H) + out (tc,bt,H), fp32, double-buffered, + weights.
        return 2 * 4 * (tc * bt * 4 * H) + weight_bytes

    tc, bt = T, B
    if block_bytes(tc, bt) <= budget_bytes:
        return tc, bt
    # Shrink the time chunk (hidden state carried in scratch) before the batch.
    while tc > 1 and block_bytes(tc, bt) > budget_bytes:
        tc = -(-tc // 2)
    if block_bytes(tc, bt) <= budget_bytes:
        return tc, bt
    per_row = 2 * 4 * 4 * H            # tc=1, one batch row, double-buffered fp32
    bt = max(8, ((budget_bytes - weight_bytes) // per_row) // 8 * 8)
    return 1, min(B, bt)


def run_gru_sequence(gi_tbg, w_hh, b_hh, vmem_limit):
    T, B, G3 = gi_tbg.shape
    H = w_hh.shape[0]
    tc, bt = _choose_seq_tiles(T, B, H, int(vmem_limit * 0.85))

    T_pad = _round_up(T, tc)
    B_pad = B if bt == B else _round_up(B, bt)
    if (T_pad, B_pad) != (T, B):
        # Padded rows/steps are finite garbage and are sliced off below.
        gi_tbg = jnp.pad(gi_tbg, ((0, T_pad - T), (0, B_pad - B), (0, 0)))
    grid = (B_pad // bt, T_pad // tc)

    out = pl.pallas_call(
        gru_seq_kernel,
        out_shape=jax.ShapeDtypeStruct((T_pad, B_pad, H), jnp.float32),
        grid_spec=pltpu.PrefetchScalarGridSpec(
            num_scalar_prefetch=0,
            grid=grid,
            in_specs=[pl.BlockSpec((tc, bt, G3), lambda j, s: (s, j, 0)),
                      pl.BlockSpec((H, G3), lambda j, s: (0, 0)),
                      pl.BlockSpec((1, G3), lambda j, s: (0, 0))],
            out_specs=pl.BlockSpec((tc, bt, H), lambda j, s: (s, j, 0)),
            scratch_shapes=[pltpu.VMEM((bt, H), jnp.float32)]),
        compiler_params=pltpu.CompilerParams(
            # batch tiles are independent ("parallel"); time chunks carry the
            # hidden state in scratch ("arbitrary", iterated innermost).
            dimension_semantics=("parallel", "arbitrary"),
            vmem_limit_bytes=vmem_limit),
    )(gi_tbg, w_hh, b_hh)
    return out[:T, :B]


# -------- Kernel 2: noise scores (one GRU step per candidate) --------------- #
def noise_kernel(x_ref, h_ref, w_ih_ref, w_hh_ref, b_ih_ref, b_hh_ref,
                 w_s_ref, b_s_ref, out_ref):
    # x_ref:  (Nr*TG, D) bf16 noise embeddings, candidate-major: rows
    #         [c*TG:(c+1)*TG] are candidate c for this tile's TG groups.
    # h_ref:  (TG, H) fp32, one hidden row per (t, b) group.
    # out_ref: (1, 1, Nr*TG) lane-dense score row (same candidate-major order).
    TG = h_ref.shape[0]
    nr = x_ref.shape[0] // TG

    h = h_ref[...]                                                      # (TG, H)

    # bf16 operands on the MXU, fp32 accumulation (single step, no compounding).
    gi = (jnp.dot(x_ref[...], w_ih_ref[...],
                  preferred_element_type=jnp.float32) + b_ih_ref[...])  # (Nr*TG, 3H)
    gh_small = (jnp.dot(h.astype(w_hh_ref.dtype), w_hh_ref[...],
                        preferred_element_type=jnp.float32)
                + b_hh_ref[...])                                        # (TG, 3H)

    # Candidate-major layout => replication across Nr is a sublane-aligned
    # concat (TG % 16 == 0).  No 0/1 matmul, no per-step iota/compare.
    gh = jnp.concatenate([gh_small] * nr, axis=0)                       # (Nr*TG, 3H)
    h_rep = jnp.concatenate([h] * nr, axis=0)                           # (Nr*TG, H)

    h_new = _gru_update(gi, gh, h_rep)                                  # (Nr*TG, H)

    # (1,H) x (Nr*TG,H) contracting H -> (1, Nr*TG); lane-dense store, and no
    # explicit (H, Nr*TG) transpose of h_new is materialized.
    scores = lax.dot_general(w_s_ref[...], h_new,
                             (((1,), (1,)), ((), ())),
                             preferred_element_type=jnp.float32) + b_s_ref[...]
    out_ref[0] = scores


def run_noise_scores(emb_bf16, noise_idx_tbr, h_rows, w_ih_bf16, w_hh_bf16,
                     b_ih, b_hh, w_s_row, b_s, vmem_limit, rows_per_tile=1024):
    """noise_idx_tbr: (T-1, B, Nr) indices, group order (t, b);
    h_rows: (M, H) with M = (T-1)*B.  Returns (M, Nr) scores."""
    M, H = h_rows.shape
    nr = noise_idx_tbr.shape[-1]
    D = emb_bf16.shape[1]

    # Groups per tile: ~rows_per_tile candidate rows (sweep per generation),
    # capped by a VMEM estimate, multiple of 16 sublanes (bf16 x tile).
    budget = vmem_limit // 2
    bytes_per_group = nr * (4 * D + 40 * H + 8) + 8 * H
    tg = max(1, rows_per_tile // nr)
    tg = min(tg, max(1, budget // max(1, bytes_per_group)))
    tg = max(16, _round_up(tg, 16))
    tg = min(tg, _round_up(M, 16))
    tgn = tg * nr
    g = -(-M // tg)
    m_pad = g * tg

    # Pad groups (token 0 is a valid row -> finite garbage, sliced off) and
    # reorder indices candidate-major per tile BEFORE the gather, so the
    # embedding matrix lands in kernel layout with no extra HBM pass.
    idx = jnp.pad(noise_idx_tbr.reshape(M, nr), ((0, m_pad - M), (0, 0)))
    idx_cm = jnp.transpose(idx.reshape(g, tg, nr), (0, 2, 1)).reshape(-1)
    x_cm = emb_bf16[idx_cm]                                             # (g*tgn, D)
    h_p = jnp.pad(h_rows, ((0, m_pad - M), (0, 0)))

    out = pl.pallas_call(
        noise_kernel,
        out_shape=jax.ShapeDtypeStruct((g, 1, tgn), jnp.float32),
        grid_spec=pltpu.PrefetchScalarGridSpec(
            num_scalar_prefetch=0,
            grid=(g,),
            in_specs=[pl.BlockSpec((tgn, D), lambda i: (i, 0)),
                      pl.BlockSpec((tg, H), lambda i: (i, 0)),
                      pl.BlockSpec((D, 3 * H), lambda i: (0, 0)),
                      pl.BlockSpec((H, 3 * H), lambda i: (0, 0)),
                      pl.BlockSpec((1, 3 * H), lambda i: (0, 0)),
                      pl.BlockSpec((1, 3 * H), lambda i: (0, 0)),
                      pl.BlockSpec((1, H), lambda i: (0, 0)),
                      pl.BlockSpec((1, 1), lambda i: (0, 0))],
            out_specs=pl.BlockSpec((1, 1, tgn), lambda i: (i, 0, 0))),
        compiler_params=pltpu.CompilerParams(
            dimension_semantics=("parallel",),
            vmem_limit_bytes=vmem_limit),
    )(x_cm, h_p, w_ih_bf16, w_hh_bf16, b_ih, b_hh, w_s_row, b_s)

    # Undo the candidate-major ordering (tiny score tensor) and drop padding.
    scores = jnp.transpose(out.reshape(g, nr, tg), (0, 2, 1)).reshape(m_pad, nr)
    return scores[:M]


# ------------------------------ Forward pass ------------------------------- #
def index_gru_forward(params, target_idx, noise_idx, input_ids):
    del target_idx  # unused in the NCE branch of the reference module
    emb_tbl = params["emb"]
    w_ih, w_hh = params["w_ih"], params["w_hh"]
    b_ih, b_hh = params["b_ih"], params["b_hh"]
    w_s_row, b_s = params["w_s"], params["b_s"]            # (1, H), (1, 1)

    B, T = input_ids.shape
    H = w_hh.shape[0]
    D = emb_tbl.shape[1]
    Nr = noise_idx.shape[2]
    vmem_limit = _vmem_limit_bytes()

    # bf16 operands for the MXU (fp32 accumulation); biases / recurrence fp32.
    emb_bf16 = emb_tbl.astype(jnp.bfloat16)
    w_ih_bf16 = w_ih.astype(jnp.bfloat16)
    w_hh_bf16 = w_hh.astype(jnp.bfloat16)

    # Gather embeddings directly in time-major order (transpose the tiny index
    # tensor, not the activations) and produce gi straight in (T, B, 3H).
    input_emb_tbd = emb_bf16[input_ids.T]                               # (T, B, D)
    gi_tbg = (jnp.dot(input_emb_tbd.reshape(T * B, D), w_ih_bf16,
                      preferred_element_type=jnp.float32)
              + b_ih).reshape(T, B, 3 * H)                              # fp32

    rnn_out_tbh = run_gru_sequence(gi_tbg, w_hh, b_hh, vmem_limit)      # (T, B, H)

    # target_score = Linear(rnn_output[:, 1:]); only the (B, T-1) result is
    # transposed, never the full hidden-state activations.
    target_score = (jnp.einsum("tbh,h->bt", rnn_out_tbh[1:], w_s_row[0])
                    + b_s[0, 0])                                        # (B, T-1)

    # Noise path: one GRU step per (t, b, r) with h0 = rnn_output[b, t].
    # Group order is (t, b) so h_rows is a contiguous reshape (no transpose).
    h_rows = rnn_out_tbh[:-1].reshape((T - 1) * B, H)
    noise_idx_tbr = jnp.transpose(noise_idx, (1, 0, 2))                 # tiny int32
    noise_tb = run_noise_scores(emb_bf16, noise_idx_tbr, h_rows,
                                w_ih_bf16, w_hh_bf16, b_ih, b_hh,
                                w_s_row, b_s, vmem_limit)               # ((T-1)*B, Nr)
    noise_score = jnp.transpose(noise_tb.reshape(T - 1, B, Nr), (1, 0, 2))
    return target_score, noise_score


# ------------------------- Pure-JAX reference check ------------------------ #
def index_gru_reference(params, target_idx, noise_idx, input_ids):
    del target_idx
    emb_tbl = params["emb"]
    w_ih, w_hh = params["w_ih"], params["w_hh"]
    b_ih, b_hh = params["b_ih"], params["b_hh"]
    w_s_row, b_s = params["w_s"], params["b_s"]

    input_emb = emb_tbl[input_ids]
    B, T, D = input_emb.shape
    H = w_hh.shape[0]
    Nr = noise_idx.shape[2]

    def cell(x, h):
        gi = jnp.dot(x, w_ih, preferred_element_type=jnp.float32) + b_ih
        gh = jnp.dot(h, w_hh, preferred_element_type=jnp.float32) + b_hh
        return _gru_update(gi, gh, h)

    def step(h, x_t):
        h_new = cell(x_t, h)
        return h_new, h_new

    h0 = jnp.zeros((B, H), jnp.float32)
    _, hs = lax.scan(step, h0, jnp.transpose(input_emb, (1, 0, 2)))     # (T, B, H)
    rnn_output = jnp.transpose(hs, (1, 0, 2))                           # (B, T, H)

    target_score = (jnp.einsum("bth,h->bt", rnn_output[:, 1:, :], w_s_row[0])
                    + b_s[0, 0])

    noise_emb = emb_tbl[noise_idx.reshape(-1)]
    h_init = jnp.broadcast_to(rnn_output[:, :-1, None, :],
                              (B, T - 1, Nr, H)).reshape(-1, H)
    h_new = cell(noise_emb, h_init)
    noise_score = (jnp.einsum("mh,h->m", h_new, w_s_row[0])
                   + b_s[0, 0]).reshape(noise_idx.shape)
    return target_score, noise_score


if __name__ == "__main__":
    ntoken, ninp, nhid = 50, 32, 32        # ninp == nhid (required by the module)
    B, T, Nr = 2, 8, 4

    key = jax.random.PRNGKey(0)
    keys = jax.random.split(key, 10)
    scale = 1.0 / np.sqrt(nhid)
    params = {
        "emb":  0.1 * jax.random.normal(keys[0], (ntoken, ninp), jnp.float32),
        # GRU weights stored transposed relative to PyTorch: (in, 3H), gates [r|z|n]
        "w_ih": jax.random.uniform(keys[1], (ninp, 3 * nhid), jnp.float32, -scale, scale),
        "w_hh": jax.random.uniform(keys[2], (nhid, 3 * nhid), jnp.float32, -scale, scale),
        "b_ih": jax.random.uniform(keys[3], (1, 3 * nhid), jnp.float32, -scale, scale),
        "b_hh": jax.random.uniform(keys[4], (1, 3 * nhid), jnp.float32, -scale, scale),
        # scorer: Linear(nhid, 1), stored as a row (1, H) / (1, 1)
        "w_s":  jax.random.uniform(keys[5], (1, nhid), jnp.float32, -scale, scale),
        "b_s":  jax.random.uniform(keys[6], (1, 1), jnp.float32, -scale, scale),
    }

    input_ids = jax.random.randint(keys[7], (B, T), 0, ntoken)
    target_idx = jax.random.randint(keys[8], (B, T - 1), 0, ntoken)
    noise_idx = jax.random.randint(keys[9], (B, T - 1, Nr), 0, ntoken)

    target_score, noise_score = jax.jit(index_gru_forward)(
        params, target_idx, noise_idx, input_ids)
    jax.block_until_ready((target_score, noise_score))

    # sanity check against a pure-JAX (lax.scan) fp32 reference
    ref_t, ref_n = jax.jit(index_gru_reference)(
        params, target_idx, noise_idx, input_ids)
    jax.block_until_ready((ref_t, ref_n))

    assert target_score.shape == (B, T - 1), target_score.shape
    assert noise_score.shape == (B, T - 1, Nr), noise_score.shape
    assert np.allclose(np.asarray(target_score), np.asarray(ref_t),
                       rtol=1e-2, atol=1e-2)
    assert np.allclose(np.asarray(noise_score), np.asarray(ref_n),
                       rtol=1e-2, atol=1e-2)

    print("KERNEL_OK")
</pallas_src>

<mosaic_0001>
module attributes {stable_mosaic.version = 11 : i64} {
  func.func @gru_seq_kernel(%arg0: i32, %arg1: i32, %arg2: memref<8x2x96xf32, #tpu.memory_space<vmem>>, %arg3: memref<32x96xf32, #tpu.memory_space<vmem>>, %arg4: memref<1x96xf32, #tpu.memory_space<vmem>>, %arg5: memref<8x2x32xf32, #tpu.memory_space<vmem>>, %arg6: memref<2x32xf32, #tpu.memory_space<vmem>>) attributes {dimension_semantics = [#tpu.dimension_semantics<parallel>, #tpu.dimension_semantics<arbitrary>], iteration_bounds = array<i64: 1, 1>, scalar_prefetch = 0 : i64, scratch_operands = 1 : i64, tpu.core_type = #tpu.core_type<tc>, window_params = [{transform_indices = @transform_0, window_bounds = array<i64: 8, 2, 96>}, {pipeline_mode = #tpu.pipeline_mode<synchronous>, transform_indices = @transform_1, window_bounds = array<i64: 32, 96>}, {pipeline_mode = #tpu.pipeline_mode<synchronous>, transform_indices = @transform_2, window_bounds = array<i64: 1, 96>}, {transform_indices = @transform_3, window_bounds = array<i64: 8, 2, 32>}]} {
    %c0_i32 = arith.constant 0 : i32
    %0 = arith.cmpi eq, %arg1, %c0_i32 : i32
    %1 = arith.extui %0 : i1 to i32
    %c0_i32_0 = arith.constant 0 : i32
    %2 = arith.cmpi ne, %1, %c0_i32_0 : i32
    scf.if %2 {
      %cst_72 = arith.constant 0.000000e+00 : f32
      %295 = vector.broadcast %cst_72 : f32 to vector<2x32xf32>
      %c0_73 = arith.constant 0 : index
      %c0_74 = arith.constant 0 : index
      %296 = vector.load %arg6[%c0_73, %c0_74] : memref<2x32xf32, #tpu.memory_space<vmem>>, vector<2x32xf32>
      tpu.vector_store %arg6[%c0_73, %c0_74], %295 {strides = array<i32>} : memref<2x32xf32, #tpu.memory_space<vmem>>, vector<2x32xf32>,
    } else {
    }
    %c0 = arith.constant 0 : index
    %c0_1 = arith.constant 0 : index
    %3 = vector.load %arg3[%c0, %c0_1] : memref<32x96xf32, #tpu.memory_space<vmem>>, vector<32x96xf32>
    %c0_2 = arith.constant 0 : index
    %c0_3 = arith.constant 0 : index
    %4 = vector.load %arg4[%c0_2, %c0_3] : memref<1x96xf32, #tpu.memory_space<vmem>>, vector<1x96xf32>
    %c0_4 = arith.constant 0 : index
    %c0_5 = arith.constant 0 : index
    %5 = vector.load %arg6[%c0_4, %c0_5] : memref<2x32xf32, #tpu.memory_space<vmem>>, vector<2x32xf32>
    %c0_i32_6 = arith.constant 0 : i32
    %6 = arith.index_cast %c0_i32_6 : i32 to index
    %c0_7 = arith.constant 0 : index
    %c0_8 = arith.constant 0 : index
    %7 = vector.load %arg2[%6, %c0_7, %c0_8] : memref<8x2x96xf32, #tpu.memory_space<vmem>>, vector<1x2x96xf32>
    %8 = vector.shape_cast %7 : vector<1x2x96xf32> to vector<2x96xf32>
    %cst = arith.constant dense<0.000000e+00> : vector<2x96xf32>
    %9 = tpu.matmul %5, %3, %cst {dimension_numbers = #tpu.dot_dimension_numbers<[1], [0], [0], [1], [0, 0, 1, 1], [], []>} : vector<2x32xf32>, vector<32x96xf32>, vector<2x96xf32> -> vector<2x96xf32>
    %10 = vector.broadcast %4 : vector<1x96xf32> to vector<2x96xf32>
    %11 = arith.addf %9, %10 : vector<2x96xf32>
    %12 = vector.extract_strided_slice %8 {offsets = [0, 0], sizes = [2, 32], strides = [1, 1]} : vector<2x96xf32> to vector<2x32xf32>
    %13 = vector.extract_strided_slice %11 {offsets = [0, 0], sizes = [2, 32], strides = [1, 1]} : vector<2x96xf32> to vector<2x32xf32>
    %14 = arith.addf %12, %13 : vector<2x32xf32>
    %15 = arith.negf %14 : vector<2x32xf32>
    %16 = math.exp %15 : vector<2x32xf32>
    %cst_9 = arith.constant 1.000000e+00 : f32
    %17 = vector.broadcast %cst_9 : f32 to vector<2x32xf32>
    %18 = arith.addf %17, %16 : vector<2x32xf32>
    %19 = arith.divf %17, %18 : vector<2x32xf32>
    %20 = vector.extract_strided_slice %8 {offsets = [0, 32], sizes = [2, 32], strides = [1, 1]} : vector<2x96xf32> to vector<2x32xf32>
    %21 = vector.extract_strided_slice %11 {offsets = [0, 32], sizes = [2, 32], strides = [1, 1]} : vector<2x96xf32> to vector<2x32xf32>
    %22 = arith.addf %20, %21 : vector<2x32xf32>
    %23 = arith.negf %22 : vector<2x32xf32>
    %24 = math.exp %23 : vector<2x32xf32>
    %cst_10 = arith.constant 1.000000e+00 : f32
    %25 = vector.broadcast %cst_10 : f32 to vector<2x32xf32>
    %26 = arith.addf %25, %24 : vector<2x32xf32>
    %27 = arith.divf %25, %26 : vector<2x32xf32>
    %28 = vector.extract_strided_slice %8 {offsets = [0, 64], sizes = [2, 32], strides = [1, 1]} : vector<2x96xf32> to vector<2x32xf32>
    %29 = vector.extract_strided_slice %11 {offsets = [0, 64], sizes = [2, 32], strides = [1, 1]} : vector<2x96xf32> to vector<2x32xf32>
    %30 = arith.mulf %19, %29 : vector<2x32xf32>
    %31 = arith.addf %28, %30 : vector<2x32xf32>
    %32 = math.tanh %31 : vector<2x32xf32>
    %cst_11 = arith.constant 1.000000e+00 : f32
    %33 = vector.broadcast %cst_11 : f32 to vector<2x32xf32>
    %34 = arith.subf %33, %27 : vector<2x32xf32>
    %35 = arith.mulf %34, %32 : vector<2x32xf32>
    %36 = arith.mulf %27, %5 : vector<2x32xf32>
    %37 = arith.addf %35, %36 : vector<2x32xf32>
    %38 = arith.index_cast %c0_i32_6 : i32 to index
    %c0_12 = arith.constant 0 : index
    %c0_13 = arith.constant 0 : index
    %39 = vector.load %arg5[%38, %c0_12, %c0_13] : memref<8x2x32xf32, #tpu.memory_space<vmem>>, vector<1x2x32xf32>
    %40 = vector.shape_cast %39 : vector<1x2x32xf32> to vector<2x32xf32>
    %41 = vector.shape_cast %37 : vector<2x32xf32> to vector<1x2x32xf32>
    tpu.vector_store %arg5[%38, %c0_12, %c0_13], %41 {strides = array<i32>} : memref<8x2x32xf32, #tpu.memory_space<vmem>>, vector<1x2x32xf32>,
    %c1_i32 = arith.constant 1 : i32
    %42 = arith.index_cast %c1_i32 : i32 to index
    %c0_14 = arith.constant 0 : index
    %c0_15 = arith.constant 0 : index
    %43 = vector.load %arg2[%42, %c0_14, %c0_15] : memref<8x2x96xf32, #tpu.memory_space<vmem>>, vector<1x2x96xf32>
    %44 = vector.shape_cast %43 : vector<1x2x96xf32> to vector<2x96xf32>
    %cst_16 = arith.constant dense<0.000000e+00> : vector<2x96xf32>
    %45 = tpu.matmul %37, %3, %cst_16 {dimension_numbers = #tpu.dot_dimension_numbers<[1], [0], [0], [1], [0, 0, 1, 1], [], []>} : vector<2x32xf32>, vector<32x96xf32>, vector<2x96xf32> -> vector<2x96xf32>
    %46 = vector.broadcast %4 : vector<1x96xf32> to vector<2x96xf32>
    %47 = arith.addf %45, %46 : vector<2x96xf32>
    %48 = vector.extract_strided_slice %44 {offsets = [0, 0], sizes = [2, 32], strides = [1, 1]} : vector<2x96xf32> to vector<2x32xf32>
    %49 = vector.extract_strided_slice %47 {offsets = [0, 0], sizes = [2, 32], strides = [1, 1]} : vector<2x96xf32> to vector<2x32xf32>
    %50 = arith.addf %48, %49 : vector<2x32xf32>
    %51 = arith.negf %50 : vector<2x32xf32>
    %52 = math.exp %51 : vector<2x32xf32>
    %cst_17 = arith.constant 1.000000e+00 : f32
    %53 = vector.broadcast %cst_17 : f32 to vector<2x32xf32>
    %54 = arith.addf %53, %52 : vector<2x32xf32>
    %55 = arith.divf %53, %54 : vector<2x32xf32>
    %56 = vector.extract_strided_slice %44 {offsets = [0, 32], sizes = [2, 32], strides = [1, 1]} : vector<2x96xf32> to vector<2x32xf32>
    %57 = vector.extract_strided_slice %47 {offsets = [0, 32], sizes = [2, 32], strides = [1, 1]} : vector<2x96xf32> to vector<2x32xf32>
    %58 = arith.addf %56, %57 : vector<2x32xf32>
    %59 = arith.negf %58 : vector<2x32xf32>
    %60 = math.exp %59 : vector<2x32xf32>
    %cst_18 = arith.constant 1.000000e+00 : f32
    %61 = vector.broadcast %cst_18 : f32 to vector<2x32xf32>
    %62 = arith.addf %61, %60 : vector<2x32xf32>
    %63 = arith.divf %61, %62 : vector<2x32xf32>
    %64 = vector.extract_strided_slice %44 {offsets = [0, 64], sizes = [2, 32], strides = [1, 1]} : vector<2x96xf32> to vector<2x32xf32>
    %65 = vector.extract_strided_slice %47 {offsets = [0, 64], sizes = [2, 32], strides = [1, 1]} : vector<2x96xf32> to vector<2x32xf32>
    %66 = arith.mulf %55, %65 : vector<2x32xf32>
    %67 = arith.addf %64, %66 : vector<2x32xf32>
    %68 = math.tanh %67 : vector<2x32xf32>
    %cst_19 = arith.constant 1.000000e+00 : f32
    %69 = vector.broadcast %cst_19 : f32 to vector<2x32xf32>
    %70 = arith.subf %69, %63 : vector<2x32xf32>
    %71 = arith.mulf %70, %68 : vector<2x32xf32>
    %72 = arith.mulf %63, %37 : vector<2x32xf32>
    %73 = arith.addf %71, %72 : vector<2x32xf32>
    %74 = arith.index_cast %c1_i32 : i32 to index
    %c0_20 = arith.constant 0 : index
    %c0_21 = arith.constant 0 : index
    %75 = vector.load %arg5[%74, %c0_20, %c0_21] : memref<8x2x32xf32, #tpu.memory_space<vmem>>, vector<1x2x32xf32>
    %76 = vector.shape_cast %75 : vector<1x2x32xf32> to vector<2x32xf32>
    %77 = vector.shape_cast %73 : vector<2x32xf32> to vector<1x2x32xf32>
    tpu.vector_store %arg5[%74, %c0_20, %c0_21], %77 {strides = array<i32>} : memref<8x2x32xf32, #tpu.memory_space<vmem>>, vector<1x2x32xf32>,
    %c2_i32 = arith.constant 2 : i32
    %78 = arith.index_cast %c2_i32 : i32 to index
    %c0_22 = arith.constant 0 : index
    %c0_23 = arith.constant 0 : index
    %79 = vector.load %arg2[%78, %c0_22, %c0_23] : memref<8x2x96xf32, #tpu.memory_space<vmem>>, vector<1x2x96xf32>
    %80 = vector.shape_cast %79 : vector<1x2x96xf32> to vector<2x96xf32>
    %cst_24 = arith.constant dense<0.000000e+00> : vector<2x96xf32>
    %81 = tpu.matmul %73, %3, %cst_24 {dimension_numbers = #tpu.dot_dimension_numbers<[1], [0], [0], [1], [0, 0, 1, 1], [], []>} : vector<2x32xf32>, vector<32x96xf32>, vector<2x96xf32> -> vector<2x96xf32>
    %82 = vector.broadcast %4 : vector<1x96xf32> to vector<2x96xf32>
    %83 = arith.addf %81, %82 : vector<2x96xf32>
    %84 = vector.extract_strided_slice %80 {offsets = [0, 0], sizes = [2, 32], strides = [1, 1]} : vector<2x96xf32> to vector<2x32xf32>
    %85 = vector.extract_strided_slice %83 {offsets = [0, 0], sizes = [2, 32], strides = [1, 1]} : vector<2x96xf32> to vector<2x32xf32>
    %86 = arith.addf %84, %85 : vector<2x32xf32>
    %87 = arith.negf %86 : vector<2x32xf32>
    %88 = math.exp %87 : vector<2x32xf32>
    %cst_25 = arith.constant 1.000000e+00 : f32
    %89 = vector.broadcast %cst_25 : f32 to vector<2x32xf32>
    %90 = arith.addf %89, %88 : vector<2x32xf32>
    %91 = arith.divf %89, %90 : vector<2x32xf32>
    %92 = vector.extract_strided_slice %80 {offsets = [0, 32], sizes = [2, 32], strides = [1, 1]} : vector<2x96xf32> to vector<2x32xf32>
    %93 = vector.extract_strided_slice %83 {offsets = [0, 32], sizes = [2, 32], strides = [1, 1]} : vector<2x96xf32> to vector<2x32xf32>
    %94 = arith.addf %92, %93 : vector<2x32xf32>
    %95 = arith.negf %94 : vector<2x32xf32>
    %96 = math.exp %95 : vector<2x32xf32>
    %cst_26 = arith.constant 1.000000e+00 : f32
    %97 = vector.broadcast %cst_26 : f32 to vector<2x32xf32>
    %98 = arith.addf %97, %96 : vector<2x32xf32>
    %99 = arith.divf %97, %98 : vector<2x32xf32>
    %100 = vector.extract_strided_slice %80 {offsets = [0, 64], sizes = [2, 32], strides = [1, 1]} : vector<2x96xf32> to vector<2x32xf32>
    %101 = vector.extract_strided_slice %83 {offsets = [0, 64], sizes = [2, 32], strides = [1, 1]} : vector<2x96xf32> to vector<2x32xf32>
    %102 = arith.mulf %91, %101 : vector<2x32xf32>
    %103 = arith.addf %100, %102 : vector<2x32xf32>
    %104 = math.tanh %103 : vector<2x32xf32>
    %cst_27 = arith.constant 1.000000e+00 : f32
    %105 = vector.broadcast %cst_27 : f32 to vector<2x32xf32>
    %106 = arith.subf %105, %99 : vector<2x32xf32>
    %107 = arith.mulf %106, %104 : vector<2x32xf32>
    %108 = arith.mulf %99, %73 : vector<2x32xf32>
    %109 = arith.addf %107, %108 : vector<2x32xf32>
    %110 = arith.index_cast %c2_i32 : i32 to index
    %c0_28 = arith.constant 0 : index
    %c0_29 = arith.constant 0 : index
    %111 = vector.load %arg5[%110, %c0_28, %c0_29] : memref<8x2x32xf32, #tpu.memory_space<vmem>>, vector<1x2x32xf32>
    %112 = vector.shape_cast %111 : vector<1x2x32xf32> to vector<2x32xf32>
    %113 = vector.shape_cast %109 : vector<2x32xf32> to vector<1x2x32xf32>
    tpu.vector_store %arg5[%110, %c0_28, %c0_29], %113 {strides = array<i32>} : memref<8x2x32xf32, #tpu.memory_space<vmem>>, vector<1x2x32xf32>,
    %c3_i32 = arith.constant 3 : i32
    %114 = arith.index_cast %c3_i32 : i32 to index
    %c0_30 = arith.constant 0 : index
    %c0_31 = arith.constant 0 : index
    %115 = vector.load %arg2[%114, %c0_30, %c0_31] : memref<8x2x96xf32, #tpu.memory_space<vmem>>, vector<1x2x96xf32>
    %116 = vector.shape_cast %115 : vector<1x2x96xf32> to vector<2x96xf32>
    %cst_32 = arith.constant dense<0.000000e+00> : vector<2x96xf32>
    %117 = tpu.matmul %109, %3, %cst_32 {dimension_numbers = #tpu.dot_dimension_numbers<[1], [0], [0], [1], [0, 0, 1, 1], [], []>} : vector<2x32xf32>, vector<32x96xf32>, vector<2x96xf32> -> vector<2x96xf32>
    %118 = vector.broadcast %4 : vector<1x96xf32> to vector<2x96xf32>
    %119 = arith.addf %117, %118 : vector<2x96xf32>
    %120 = vector.extract_strided_slice %116 {offsets = [0, 0], sizes = [2, 32], strides = [1, 1]} : vector<2x96xf32> to vector<2x32xf32>
    %121 = vector.extract_strided_slice %119 {offsets = [0, 0], sizes = [2, 32], strides = [1, 1]} : vector<2x96xf32> to vector<2x32xf32>
    %122 = arith.addf %120, %121 : vector<2x32xf32>
    %123 = arith.negf %122 : vector<2x32xf32>
    %124 = math.exp %123 : vector<2x32xf32>
    %cst_33 = arith.constant 1.000000e+00 : f32
    %125 = vector.broadcast %cst_33 : f32 to vector<2x32xf32>
    %126 = arith.addf %125, %124 : vector<2x32xf32>
    %127 = arith.divf %125, %126 : vector<2x32xf32>
    %128 = vector.extract_strided_slice %116 {offsets = [0, 32], sizes = [2, 32], strides = [1, 1]} : vector<2x96xf32> to vector<2x32xf32>
    %129 = vector.extract_strided_slice %119 {offsets = [0, 32], sizes = [2, 32], strides = [1, 1]} : vector<2x96xf32> to vector<2x32xf32>
    %130 = arith.addf %128, %129 : vector<2x32xf32>
    %131 = arith.negf %130 : vector<2x32xf32>
    %132 = math.exp %131 : vector<2x32xf32>
    %cst_34 = arith.constant 1.000000e+00 : f32
    %133 = vector.broadcast %cst_34 : f32 to vector<2x32xf32>
    %134 = arith.addf %133, %132 : vector<2x32xf32>
    %135 = arith.divf %133, %134 : vector<2x32xf32>
    %136 = vector.extract_strided_slice %116 {offsets = [0, 64], sizes = [2, 32], strides = [1, 1]} : vector<2x96xf32> to vector<2x32xf32>
    %137 = vector.extract_strided_slice %119 {offsets = [0, 64], sizes = [2, 32], strides = [1, 1]} : vector<2x96xf32> to vector<2x32xf32>
    %138 = arith.mulf %127, %137 : vector<2x32xf32>
    %139 = arith.addf %136, %138 : vector<2x32xf32>
    %140 = math.tanh %139 : vector<2x32xf32>
    %cst_35 = arith.constant 1.000000e+00 : f32
    %141 = vector.broadcast %cst_35 : f32 to vector<2x32xf32>
    %142 = arith.subf %141, %135 : vector<2x32xf32>
    %143 = arith.mulf %142, %140 : vector<2x32xf32>
    %144 = arith.mulf %135, %109 : vector<2x32xf32>
    %145 = arith.addf %143, %144 : vector<2x32xf32>
    %146 = arith.index_cast %c3_i32 : i32 to index
    %c0_36 = arith.constant 0 : index
    %c0_37 = arith.constant 0 : index
    %147 = vector.load %arg5[%146, %c0_36, %c0_37] : memref<8x2x32xf32, #tpu.memory_space<vmem>>, vector<1x2x32xf32>
    %148 = vector.shape_cast %147 : vector<1x2x32xf32> to vector<2x32xf32>
    %149 = vector.shape_cast %145 : vector<2x32xf32> to vector<1x2x32xf32>
    tpu.vector_store %arg5[%146, %c0_36, %c0_37], %149 {strides = array<i32>} : memref<8x2x32xf32, #tpu.memory_space<vmem>>, vector<1x2x32xf32>,
    %c4_i32 = arith.constant 4 : i32
    %150 = arith.index_cast %c4_i32 : i32 to index
    %c0_38 = arith.constant 0 : index
    %c0_39 = arith.constant 0 : index
    %151 = vector.load %arg2[%150, %c0_38, %c0_39] : memref<8x2x96xf32, #tpu.memory_space<vmem>>, vector<1x2x96xf32>
    %152 = vector.shape_cast %151 : vector<1x2x96xf32> to vector<2x96xf32>
    %cst_40 = arith.constant dense<0.000000e+00> : vector<2x96xf32>
    %153 = tpu.matmul %145, %3, %cst_40 {dimension_numbers = #tpu.dot_dimension_numbers<[1], [0], [0], [1], [0, 0, 1, 1], [], []>} : vector<2x32xf32>, vector<32x96xf32>, vector<2x96xf32> -> vector<2x96xf32>
    %154 = vector.broadcast %4 : vector<1x96xf32> to vector<2x96xf32>
    %155 = arith.addf %153, %154 : vector<2x96xf32>
    %156 = vector.extract_strided_slice %152 {offsets = [0, 0], sizes = [2, 32], strides = [1, 1]} : vector<2x96xf32> to vector<2x32xf32>
    %157 = vector.extract_strided_slice %155 {offsets = [0, 0], sizes = [2, 32], strides = [1, 1]} : vector<2x96xf32> to vector<2x32xf32>
    %158 = arith.addf %156, %157 : vector<2x32xf32>
    %159 = arith.negf %158 : vector<2x32xf32>
    %160 = math.exp %159 : vector<2x32xf32>
    %cst_41 = arith.constant 1.000000e+00 : f32
    %161 = vector.broadcast %cst_41 : f32 to vector<2x32xf32>
    %162 = arith.addf %161, %160 : vector<2x32xf32>
    %163 = arith.divf %161, %162 : vector<2x32xf32>
    %164 = vector.extract_strided_slice %152 {offsets = [0, 32], sizes = [2, 32], strides = [1, 1]} : vector<2x96xf32> to vector<2x32xf32>
    %165 = vector.extract_strided_slice %155 {offsets = [0, 32], sizes = [2, 32], strides = [1, 1]} : vector<2x96xf32> to vector<2x32xf32>
    %166 = arith.addf %164, %165 : vector<2x32xf32>
    %167 = arith.negf %166 : vector<2x32xf32>
    %168 = math.exp %167 : vector<2x32xf32>
    %cst_42 = arith.constant 1.000000e+00 : f32
    %169 = vector.broadcast %cst_42 : f32 to vector<2x32xf32>
    %170 = arith.addf %169, %168 : vector<2x32xf32>
    %171 = arith.divf %169, %170 : vector<2x32xf32>
    %172 = vector.extract_strided_slice %152 {offsets = [0, 64], sizes = [2, 32], strides = [1, 1]} : vector<2x96xf32> to vector<2x32xf32>
    %173 = vector.extract_strided_slice %155 {offsets = [0, 64], sizes = [2, 32], strides = [1, 1]} : vector<2x96xf32> to vector<2x32xf32>
    %174 = arith.mulf %163, %173 : vector<2x32xf32>
    %175 = arith.addf %172, %174 : vector<2x32xf32>
    %176 = math.tanh %175 : vector<2x32xf32>
    %cst_43 = arith.constant 1.000000e+00 : f32
    %177 = vector.broadcast %cst_43 : f32 to vector<2x32xf32>
    %178 = arith.subf %177, %171 : vector<2x32xf32>
    %179 = arith.mulf %178, %176 : vector<2x32xf32>
    %180 = arith.mulf %171, %145 : vector<2x32xf32>
    %181 = arith.addf %179, %180 : vector<2x32xf32>
    %182 = arith.index_cast %c4_i32 : i32 to index
    %c0_44 = arith.constant 0 : index
    %c0_45 = arith.constant 0 : index
    %183 = vector.load %arg5[%182, %c0_44, %c0_45] : memref<8x2x32xf32, #tpu.memory_space<vmem>>, vector<1x2x32xf32>
    %184 = vector.shape_cast %183 : vector<1x2x32xf32> to vector<2x32xf32>
    %185 = vector.shape_cast %181 : vector<2x32xf32> to vector<1x2x32xf32>
    tpu.vector_store %arg5[%182, %c0_44, %c0_45], %185 {strides = array<i32>} : memref<8x2x32xf32, #tpu.memory_space<vmem>>, vector<1x2x32xf32>,
    %c5_i32 = arith.constant 5 : i32
    %186 = arith.index_cast %c5_i32 : i32 to index
    %c0_46 = arith.constant 0 : index
    %c0_47 = arith.constant 0 : index
    %187 = vector.load %arg2[%186, %c0_46, %c0_47] : memref<8x2x96xf32, #tpu.memory_space<vmem>>, vector<1x2x96xf32>
    %188 = vector.shape_cast %187 : vector<1x2x96xf32> to vector<2x96xf32>
    %cst_48 = arith.constant dense<0.000000e+00> : vector<2x96xf32>
    %189 = tpu.matmul %181, %3, %cst_48 {dimension_numbers = #tpu.dot_dimension_numbers<[1], [0], [0], [1], [0, 0, 1, 1], [], []>} : vector<2x32xf32>, vector<32x96xf32>, vector<2x96xf32> -> vector<2x96xf32>
    %190 = vector.broadcast %4 : vector<1x96xf32> to vector<2x96xf32>
    %191 = arith.addf %189, %190 : vector<2x96xf32>
    %192 = vector.extract_strided_slice %188 {offsets = [0, 0], sizes = [2, 32], strides = [1, 1]} : vector<2x96xf32> to vector<2x32xf32>
    %193 = vector.extract_strided_slice %191 {offsets = [0, 0], sizes = [2, 32], strides = [1, 1]} : vector<2x96xf32> to vector<2x32xf32>
    %194 = arith.addf %192, %193 : vector<2x32xf32>
    %195 = arith.negf %194 : vector<2x32xf32>
    %196 = math.exp %195 : vector<2x32xf32>
    %cst_49 = arith.constant 1.000000e+00 : f32
    %197 = vector.broadcast %cst_49 : f32 to vector<2x32xf32>
    %198 = arith.addf %197, %196 : vector<2x32xf32>
    %199 = arith.divf %197, %198 : vector<2x32xf32>
    %200 = vector.extract_strided_slice %188 {offsets = [0, 32], sizes = [2, 32], strides = [1, 1]} : vector<2x96xf32> to vector<2x32xf32>
    %201 = vector.extract_strided_slice %191 {offsets = [0, 32], sizes = [2, 32], strides = [1, 1]} : vector<2x96xf32> to vector<2x32xf32>
    %202 = arith.addf %200, %201 : vector<2x32xf32>
    %203 = arith.negf %202 : vector<2x32xf32>
    %204 = math.exp %203 : vector<2x32xf32>
    %cst_50 = arith.constant 1.000000e+00 : f32
    %205 = vector.broadcast %cst_50 : f32 to vector<2x32xf32>
    %206 = arith.addf %205, %204 : vector<2x32xf32>
    %207 = arith.divf %205, %206 : vector<2x32xf32>
    %208 = vector.extract_strided_slice %188 {offsets = [0, 64], sizes = [2, 32], strides = [1, 1]} : vector<2x96xf32> to vector<2x32xf32>
    %209 = vector.extract_strided_slice %191 {offsets = [0, 64], sizes = [2, 32], strides = [1, 1]} : vector<2x96xf32> to vector<2x32xf32>
    %210 = arith.mulf %199, %209 : vector<2x32xf32>
    %211 = arith.addf %208, %210 : vector<2x32xf32>
    %212 = math.tanh %211 : vector<2x32xf32>
    %cst_51 = arith.constant 1.000000e+00 : f32
    %213 = vector.broadcast %cst_51 : f32 to vector<2x32xf32>
    %214 = arith.subf %213, %207 : vector<2x32xf32>
    %215 = arith.mulf %214, %212 : vector<2x32xf32>
    %216 = arith.mulf %207, %181 : vector<2x32xf32>
    %217 = arith.addf %215, %216 : vector<2x32xf32>
    %218 = arith.index_cast %c5_i32 : i32 to index
    %c0_52 = arith.constant 0 : index
    %c0_53 = arith.constant 0 : index
    %219 = vector.load %arg5[%218, %c0_52, %c0_53] : memref<8x2x32xf32, #tpu.memory_space<vmem>>, vector<1x2x32xf32>
    %220 = vector.shape_cast %219 : vector<1x2x32xf32> to vector<2x32xf32>
    %221 = vector.shape_cast %217 : vector<2x32xf32> to vector<1x2x32xf32>
    tpu.vector_store %arg5[%218, %c0_52, %c0_53], %221 {strides = array<i32>} : memref<8x2x32xf32, #tpu.memory_space<vmem>>, vector<1x2x32xf32>,
    %c6_i32 = arith.constant 6 : i32
    %222 = arith.index_cast %c6_i32 : i32 to index
    %c0_54 = arith.constant 0 : index
    %c0_55 = arith.constant 0 : index
    %223 = vector.load %arg2[%222, %c0_54, %c0_55] : memref<8x2x96xf32, #tpu.memory_space<vmem>>, vector<1x2x96xf32>
    %224 = vector.shape_cast %223 : vector<1x2x96xf32> to vector<2x96xf32>
    %cst_56 = arith.constant dense<0.000000e+00> : vector<2x96xf32>
    %225 = tpu.matmul %217, %3, %cst_56 {dimension_numbers = #tpu.dot_dimension_numbers<[1], [0], [0], [1], [0, 0, 1, 1], [], []>} : vector<2x32xf32>, vector<32x96xf32>, vector<2x96xf32> -> vector<2x96xf32>
    %226 = vector.broadcast %4 : vector<1x96xf32> to vector<2x96xf32>
    %227 = arith.addf %225, %226 : vector<2x96xf32>
    %228 = vector.extract_strided_slice %224 {offsets = [0, 0], sizes = [2, 32], strides = [1, 1]} : vector<2x96xf32> to vector<2x32xf32>
    %229 = vector.extract_strided_slice %227 {offsets = [0, 0], sizes = [2, 32], strides = [1, 1]} : vector<2x96xf32> to vector<2x32xf32>
    %230 = arith.addf %228, %229 : vector<2x32xf32>
    %231 = arith.negf %230 : vector<2x32xf32>
    %232 = math.exp %231 : vector<2x32xf32>
    %cst_57 = arith.constant 1.000000e+00 : f32
    %233 = vector.broadcast %cst_57 : f32 to vector<2x32xf32>
    %234 = arith.addf %233, %232 : vector<2x32xf32>
    %235 = arith.divf %233, %234 : vector<2x32xf32>
    %236 = vector.extract_strided_slice %224 {offsets = [0, 32], sizes = [2, 32], strides = [1, 1]} : vector<2x96xf32> to vector<2x32xf32>
    %237 = vector.extract_strided_slice %227 {offsets = [0, 32], sizes = [2, 32], strides = [1, 1]} : vector<2x96xf32> to vector<2x32xf32>
    %238 = arith.addf %236, %237 : vector<2x32xf32>
    %239 = arith.negf %238 : vector<2x32xf32>
    %240 = math.exp %239 : vector<2x32xf32>
    %cst_58 = arith.constant 1.000000e+00 : f32
    %241 = vector.broadcast %cst_58 : f32 to vector<2x32xf32>
    %242 = arith.addf %241, %240 : vector<2x32xf32>
    %243 = arith.divf %241, %242 : vector<2x32xf32>
    %244 = vector.extract_strided_slice %224 {offsets = [0, 64], sizes = [2, 32], strides = [1, 1]} : vector<2x96xf32> to vector<2x32xf32>
    %245 = vector.extract_strided_slice %227 {offsets = [0, 64], sizes = [2, 32], strides = [1, 1]} : vector<2x96xf32> to vector<2x32xf32>
    %246 = arith.mulf %235, %245 : vector<2x32xf32>
    %247 = arith.addf %244, %246 : vector<2x32xf32>
    %248 = math.tanh %247 : vector<2x32xf32>
    %cst_59 = arith.constant 1.000000e+00 : f32
    %249 = vector.broadcast %cst_59 : f32 to vector<2x32xf32>
    %250 = arith.subf %249, %243 : vector<2x32xf32>
    %251 = arith.mulf %250, %248 : vector<2x32xf32>
    %252 = arith.mulf %243, %217 : vector<2x32xf32>
    %253 = arith.addf %251, %252 : vector<2x32xf32>
    %254 = arith.index_cast %c6_i32 : i32 to index
    %c0_60 = arith.constant 0 : index
    %c0_61 = arith.constant 0 : index
    %255 = vector.load %arg5[%254, %c0_60, %c0_61] : memref<8x2x32xf32, #tpu.memory_space<vmem>>, vector<1x2x32xf32>
    %256 = vector.shape_cast %255 : vector<1x2x32xf32> to vector<2x32xf32>
    %257 = vector.shape_cast %253 : vector<2x32xf32> to vector<1x2x32xf32>
    tpu.vector_store %arg5[%254, %c0_60, %c0_61], %257 {strides = array<i32>} : memref<8x2x32xf32, #tpu.memory_space<vmem>>, vector<1x2x32xf32>,
    %c7_i32 = arith.constant 7 : i32
    %258 = arith.index_cast %c7_i32 : i32 to index
    %c0_62 = arith.constant 0 : index
    %c0_63 = arith.constant 0 : index
    %259 = vector.load %arg2[%258, %c0_62, %c0_63] : memref<8x2x96xf32, #tpu.memory_space<vmem>>, vector<1x2x96xf32>
    %260 = vector.shape_cast %259 : vector<1x2x96xf32> to vector<2x96xf32>
    %cst_64 = arith.constant dense<0.000000e+00> : vector<2x96xf32>
    %261 = tpu.matmul %253, %3, %cst_64 {dimension_numbers = #tpu.dot_dimension_numbers<[1], [0], [0], [1], [0, 0, 1, 1], [], []>} : vector<2x32xf32>, vector<32x96xf32>, vector<2x96xf32> -> vector<2x96xf32>
    %262 = vector.broadcast %4 : vector<1x96xf32> to vector<2x96xf32>
    %263 = arith.addf %261, %262 : vector<2x96xf32>
    %264 = vector.extract_strided_slice %260 {offsets = [0, 0], sizes = [2, 32], strides = [1, 1]} : vector<2x96xf32> to vector<2x32xf32>
    %265 = vector.extract_strided_slice %263 {offsets = [0, 0], sizes = [2, 32], strides = [1, 1]} : vector<2x96xf32> to vector<2x32xf32>
    %266 = arith.addf %264, %265 : vector<2x32xf32>
    %267 = arith.negf %266 : vector<2x32xf32>
    %268 = math.exp %267 : vector<2x32xf32>
    %cst_65 = arith.constant 1.000000e+00 : f32
    %269 = vector.broadcast %cst_65 : f32 to vector<2x32xf32>
    %270 = arith.addf %269, %268 : vector<2x32xf32>
    %271 = arith.divf %269, %270 : vector<2x32xf32>
    %272 = vector.extract_strided_slice %260 {offsets = [0, 32], sizes = [2, 32], strides = [1, 1]} : vector<2x96xf32> to vector<2x32xf32>
    %273 = vector.extract_strided_slice %263 {offsets = [0, 32], sizes = [2, 32], strides = [1, 1]} : vector<2x96xf32> to vector<2x32xf32>
    %274 = arith.addf %272, %273 : vector<2x32xf32>
    %275 = arith.negf %274 : vector<2x32xf32>
    %276 = math.exp %275 : vector<2x32xf32>
    %cst_66 = arith.constant 1.000000e+00 : f32
    %277 = vector.broadcast %cst_66 : f32 to vector<2x32xf32>
    %278 = arith.addf %277, %276 : vector<2x32xf32>
    %279 = arith.divf %277, %278 : vector<2x32xf32>
    %280 = vector.extract_strided_slice %260 {offsets = [0, 64], sizes = [2, 32], strides = [1, 1]} : vector<2x96xf32> to vector<2x32xf32>
    %281 = vector.extract_strided_slice %263 {offsets = [0, 64], sizes = [2, 32], strides = [1, 1]} : vector<2x96xf32> to vector<2x32xf32>
    %282 = arith.mulf %271, %281 : vector<2x32xf32>
    %283 = arith.addf %280, %282 : vector<2x32xf32>
    %284 = math.tanh %283 : vector<2x32xf32>
    %cst_67 = arith.constant 1.000000e+00 : f32
    %285 = vector.broadcast %cst_67 : f32 to vector<2x32xf32>
    %286 = arith.subf %285, %279 : vector<2x32xf32>
    %287 = arith.mulf %286, %284 : vector<2x32xf32>
    %288 = arith.mulf %279, %253 : vector<2x32xf32>
    %289 = arith.addf %287, %288 : vector<2x32xf32>
    %290 = arith.index_cast %c7_i32 : i32 to index
    %c0_68 = arith.constant 0 : index
    %c0_69 = arith.constant 0 : index
    %291 = vector.load %arg5[%290, %c0_68, %c0_69] : memref<8x2x32xf32, #tpu.memory_space<vmem>>, vector<1x2x32xf32>
    %292 = vector.shape_cast %291 : vector<1x2x32xf32> to vector<2x32xf32>
    %293 = vector.shape_cast %289 : vector<2x32xf32> to vector<1x2x32xf32>
    tpu.vector_store %arg5[%290, %c0_68, %c0_69], %293 {strides = array<i32>} : memref<8x2x32xf32, #tpu.memory_space<vmem>>, vector<1x2x32xf32>,
    %c8_i32 = arith.constant 8 : i32
    %c0_70 = arith.constant 0 : index
    %c0_71 = arith.constant 0 : index
    %294 = vector.load %arg6[%c0_70, %c0_71] : memref<2x32xf32, #tpu.memory_space<vmem>>, vector<2x32xf32>
    tpu.vector_store %arg6[%c0_70, %c0_71], %289 {strides = array<i32>} : memref<2x32xf32, #tpu.memory_space<vmem>>, vector<2x32xf32>,
    return
  }
  func.func @transform_0(%arg0: i32, %arg1: i32) -> (i32, i32, i32) {
    %c0_i32 = arith.constant 0 : i32
    %c0_i32_0 = arith.constant 0 : i32
    return %arg1, %arg0, %c0_i32 : i32, i32, i32
  }
  func.func @transform_1(%arg0: i32, %arg1: i32) -> (i32, i32) {
    %c0_i32 = arith.constant 0 : i32
    %c0_i32_0 = arith.constant 0 : i32
    %c0_i32_1 = arith.constant 0 : i32
    return %c0_i32, %c0_i32_0 : i32, i32
  }
  func.func @transform_2(%arg0: i32, %arg1: i32) -> (i32, i32) {
    %c0_i32 = arith.constant 0 : i32
    %c0_i32_0 = arith.constant 0 : i32
    %c0_i32_1 = arith.constant 0 : i32
    return %c0_i32, %c0_i32_0 : i32, i32
  }
  func.func @transform_3(%arg0: i32, %arg1: i32) -> (i32, i32, i32) {
    %c0_i32 = arith.constant 0 : i32
    %c0_i32_0 = arith.constant 0 : i32
    return %arg1, %arg0, %c0_i32 : i32, i32, i32
  }
}

module attributes {stable_mosaic.version = 11 : i64} {
  func.func @noise_kernel(%arg0: i32, %arg1: memref<64x32xbf16, #tpu.memory_space<vmem>>, %arg2: memref<16x32xf32, #tpu.memory_space<vmem>>, %arg3: memref<32x96xbf16, #tpu.memory_space<vmem>>, %arg4: memref<32x96xbf16, #tpu.memory_space<vmem>>, %arg5: memref<1x96xf32, #tpu.memory_space<vmem>>, %arg6: memref<1x96xf32, #tpu.memory_space<vmem>>, %arg7: memref<1x32xf32, #tpu.memory_space<vmem>>, %arg8: memref<1x1xf32, #tpu.memory_space<vmem>>, %arg9: memref<1x1x64xf32, #tpu.memory_space<vmem>>) attributes {dimension_semantics = [#tpu.dimension_semantics<parallel>], iteration_bounds = array<i64: 1>, scalar_prefetch = 0 : i64, scratch_operands = 0 : i64, tpu.core_type = #tpu.core_type<tc>, window_params = [{transform_indices = @transform_0, window_bounds = array<i64: 64, 32>}, {transform_indices = @transform_1, window_bounds = array<i64: 16, 32>}, {pipeline_mode = #tpu.pipeline_mode<synchronous>, transform_indices = @transform_2, window_bounds = array<i64: 32, 96>}, {pipeline_mode = #tpu.pipeline_mode<synchronous>, transform_indices = @transform_3, window_bounds = array<i64: 32, 96>}, {pipeline_mode = #tpu.pipeline_mode<synchronous>, transform_indices = @transform_4, window_bounds = array<i64: 1, 96>}, {pipeline_mode = #tpu.pipeline_mode<synchronous>, transform_indices = @transform_5, window_bounds = array<i64: 1, 96>}, {pipeline_mode = #tpu.pipeline_mode<synchronous>, transform_indices = @transform_6, window_bounds = array<i64: 1, 32>}, {pipeline_mode = #tpu.pipeline_mode<synchronous>, transform_indices = @transform_7, window_bounds = array<i64: 1, 1>}, {transform_indices = @transform_8, window_bounds = array<i64: 1, 1, 64>}]} {
    %c0 = arith.constant 0 : index
    %c0_0 = arith.constant 0 : index
    %0 = vector.load %arg2[%c0, %c0_0] : memref<16x32xf32, #tpu.memory_space<vmem>>, vector<16x32xf32>
    %c0_1 = arith.constant 0 : index
    %c0_2 = arith.constant 0 : index
    %1 = vector.load %arg1[%c0_1, %c0_2] : memref<64x32xbf16, #tpu.memory_space<vmem>>, vector<64x32xbf16>
    %c0_3 = arith.constant 0 : index
    %c0_4 = arith.constant 0 : index
    %2 = vector.load %arg3[%c0_3, %c0_4] : memref<32x96xbf16, #tpu.memory_space<vmem>>, vector<32x96xbf16>
    %cst = arith.constant dense<0.000000e+00> : vector<64x96xf32>
    %3 = tpu.matmul %1, %2, %cst {dimension_numbers = #tpu.dot_dimension_numbers<[1], [0], [0], [1], [0, 0, 1, 1], [], []>} : vector<64x32xbf16>, vector<32x96xbf16>, vector<64x96xf32> -> vector<64x96xf32>
    %c0_5 = arith.constant 0 : index
    %c0_6 = arith.constant 0 : index
    %4 = vector.load %arg5[%c0_5, %c0_6] : memref<1x96xf32, #tpu.memory_space<vmem>>, vector<1x96xf32>
    %5 = vector.broadcast %4 : vector<1x96xf32> to vector<64x96xf32>
    %6 = arith.addf %3, %5 : vector<64x96xf32>
    %7 = arith.truncf %0 : vector<16x32xf32> to vector<16x32xbf16>
    %c0_7 = arith.constant 0 : index
    %c0_8 = arith.constant 0 : index
    %8 = vector.load %arg4[%c0_7, %c0_8] : memref<32x96xbf16, #tpu.memory_space<vmem>>, vector<32x96xbf16>
    %cst_9 = arith.constant dense<0.000000e+00> : vector<16x96xf32>
    %9 = tpu.matmul %7, %8, %cst_9 {dimension_numbers = #tpu.dot_dimension_numbers<[1], [0], [0], [1], [0, 0, 1, 1], [], []>} : vector<16x32xbf16>, vector<32x96xbf16>, vector<16x96xf32> -> vector<16x96xf32>
    %c0_10 = arith.constant 0 : index
    %c0_11 = arith.constant 0 : index
    %10 = vector.load %arg6[%c0_10, %c0_11] : memref<1x96xf32, #tpu.memory_space<vmem>>, vector<1x96xf32>
    %11 = vector.broadcast %10 : vector<1x96xf32> to vector<16x96xf32>
    %12 = arith.addf %9, %11 : vector<16x96xf32>
    %13 = tpu.concatenate %12, %12, %12, %12 in 0 : vector<16x96xf32>, vector<16x96xf32>, vector<16x96xf32>, vector<16x96xf32> -> vector<64x96xf32>
    %14 = tpu.concatenate %0, %0, %0, %0 in 0 : vector<16x32xf32>, vector<16x32xf32>, vector<16x32xf32>, vector<16x32xf32> -> vector<64x32xf32>
    %15 = vector.extract_strided_slice %6 {offsets = [0, 0], sizes = [64, 32], strides = [1, 1]} : vector<64x96xf32> to vector<64x32xf32>
    %16 = vector.extract_strided_slice %13 {offsets = [0, 0], sizes = [64, 32], strides = [1, 1]} : vector<64x96xf32> to vector<64x32xf32>
    %17 = arith.addf %15, %16 : vector<64x32xf32>
    %18 = arith.negf %17 : vector<64x32xf32>
    %19 = math.exp %18 : vector<64x32xf32>
    %cst_12 = arith.constant 1.000000e+00 : f32
    %20 = vector.broadcast %cst_12 : f32 to vector<64x32xf32>
    %21 = arith.addf %20, %19 : vector<64x32xf32>
    %22 = arith.divf %20, %21 : vector<64x32xf32>
    %23 = vector.extract_strided_slice %6 {offsets = [0, 32], sizes = [64, 32], strides = [1, 1]} : vector<64x96xf32> to vector<64x32xf32>
    %24 = vector.extract_strided_slice %13 {offsets = [0, 32], sizes = [64, 32], strides = [1, 1]} : vector<64x96xf32> to vector<64x32xf32>
    %25 = arith.addf %23, %24 : vector<64x32xf32>
    %26 = arith.negf %25 : vector<64x32xf32>
    %27 = math.exp %26 : vector<64x32xf32>
    %cst_13 = arith.constant 1.000000e+00 : f32
    %28 = vector.broadcast %cst_13 : f32 to vector<64x32xf32>
    %29 = arith.addf %28, %27 : vector<64x32xf32>
    %30 = arith.divf %28, %29 : vector<64x32xf32>
    %31 = vector.extract_strided_slice %6 {offsets = [0, 64], sizes = [64, 32], strides = [1, 1]} : vector<64x96xf32> to vector<64x32xf32>
    %32 = vector.extract_strided_slice %13 {offsets = [0, 64], sizes = [64, 32], strides = [1, 1]} : vector<64x96xf32> to vector<64x32xf32>
    %33 = arith.mulf %22, %32 : vector<64x32xf32>
    %34 = arith.addf %31, %33 : vector<64x32xf32>
    %35 = math.tanh %34 : vector<64x32xf32>
    %cst_14 = arith.constant 1.000000e+00 : f32
    %36 = vector.broadcast %cst_14 : f32 to vector<64x32xf32>
    %37 = arith.subf %36, %30 : vector<64x32xf32>
    %38 = arith.mulf %37, %35 : vector<64x32xf32>
    %39 = arith.mulf %30, %14 : vector<64x32xf32>
    %40 = arith.addf %38, %39 : vector<64x32xf32>
    %c0_15 = arith.constant 0 : index
    %c0_16 = arith.constant 0 : index
    %41 = vector.load %arg7[%c0_15, %c0_16] : memref<1x32xf32, #tpu.memory_space<vmem>>, vector<1x32xf32>
    %cst_17 = arith.constant dense<0.000000e+00> : vector<1x64xf32>
    %42 = tpu.matmul %41, %40, %cst_17 {dimension_numbers = #tpu.dot_dimension_numbers<[1], [1], [0], [0], [0, 0, 1, 0], [], []>} : vector<1x32xf32>, vector<64x32xf32>, vector<1x64xf32> -> vector<1x64xf32>
    %c0_18 = arith.constant 0 : index
    %c0_19 = arith.constant 0 : index
    %43 = vector.load %arg8[%c0_18, %c0_19] : memref<1x1xf32, #tpu.memory_space<vmem>>, vector<1x1xf32>
    %44 = vector.broadcast %43 : vector<1x1xf32> to vector<1x64xf32>
    %45 = arith.addf %42, %44 : vector<1x64xf32>
    %c0_20 = arith.constant 0 : index
    %c0_21 = arith.constant 0 : index
    %c0_22 = arith.constant 0 : index
    %46 = vector.load %arg9[%c0_20, %c0_21, %c0_22] : memref<1x1x64xf32, #tpu.memory_space<vmem>>, vector<1x1x64xf32>
    %47 = vector.shape_cast %46 : vector<1x1x64xf32> to vector<1x64xf32>
    %48 = vector.shape_cast %45 : vector<1x64xf32> to vector<1x1x64xf32>
    tpu.vector_store %arg9[%c0_20, %c0_21, %c0_22], %48 {strides = array<i32>} : memref<1x1x64xf32, #tpu.memory_space<vmem>>, vector<1x1x64xf32>,
    return
  }
  func.func @transform_0(%arg0: i32) -> (i32, i32) {
    %c0_i32 = arith.constant 0 : i32
    %c0_i32_0 = arith.constant 0 : i32
    return %arg0, %c0_i32 : i32, i32
  }
  func.func @transform_1(%arg0: i32) -> (i32, i32) {
    %c0_i32 = arith.constant 0 : i32
    %c0_i32_0 = arith.constant 0 : i32
    return %arg0, %c0_i32 : i32, i32
  }
  func.func @transform_2(%arg0: i32) -> (i32, i32) {
    %c0_i32 = arith.constant 0 : i32
    %c0_i32_0 = arith.constant 0 : i32
    %c0_i32_1 = arith.constant 0 : i32
    return %c0_i32, %c0_i32_0 : i32, i32
  }
  func.func @transform_3(%arg0: i32) -> (i32, i32) {
    %c0_i32 = arith.constant 0 : i32
    %c0_i32_0 = arith.constant 0 : i32
    %c0_i32_1 = arith.constant 0 : i32
    return %c0_i32, %c0_i32_0 : i32, i32
  }
  func.func @transform_4(%arg0: i32) -> (i32, i32) {
    %c0_i32 = arith.constant 0 : i32
    %c0_i32_0 = arith.constant 0 : i32
    %c0_i32_1 = arith.constant 0 : i32
    return %c0_i32, %c0_i32_0 : i32, i32
  }
  func.func @transform_5(%arg0: i32) -> (i32, i32) {
    %c0_i32 = arith.constant 0 : i32
    %c0_i32_0 = arith.constant 0 : i32
    %c0_i32_1 = arith.constant 0 : i32
    return %c0_i32, %c0_i32_0 : i32, i32
  }
  func.func @transform_6(%arg0: i32) -> (i32, i32) {
    %c0_i32 = arith.constant 0 : i32
    %c0_i32_0 = arith.constant 0 : i32
    %c0_i32_1 = arith.constant 0 : i32
    return %c0_i32, %c0_i32_0 : i32, i32
  }
  func.func @transform_7(%arg0: i32) -> (i32, i32) {
    %c0_i32 = arith.constant 0 : i32
    %c0_i32_0 = arith.constant 0 : i32
    %c0_i32_1 = arith.constant 0 : i32
    return %c0_i32, %c0_i32_0 : i32, i32
  }
  func.func @transform_8(%arg0: i32) -> (i32, i32, i32) {
    %c0_i32 = arith.constant 0 : i32
    %c0_i32_0 = arith.constant 0 : i32
    %c0_i32_1 = arith.constant 0 : i32
    return %arg0, %c0_i32, %c0_i32_0 : i32, i32, i32
  }
}

</mosaic_0001>

<bundles_post_ra>
// kernel: index_gru_forward.3
= control target key start
LH: loop header
LB: loop body
LE: loop exit
PB: predicated region body
PF: predicated region fallthrough
CT: control target
= control target key end

     0   :  { %vm82_vm0 = vcmask 261120   ;;  %s655_s24 = smov 64   ;;  %s1045_s2 = inlined_call_operand.vmem [shape: bf16[32,96], index: 2, kind: input, shape index: {}]   ;;  %s1046_s3 = inlined_call_operand.vmem [shape: bf16[32,96], index: 3, kind: input, shape index: {}]   ;;  %s1047_s1 = inlined_call_operand.vmem [shape: f32[16,32], index: 1, kind: input, shape index: {}]   ;;  %s1048_s0 = inlined_call_operand.vmem [shape: bf16[64,32], index: 0, kind: input, shape index: {}]   ;;  %s1049_s4 = inlined_call_operand.vmem [shape: f32[1,96], index: 4, kind: input, shape index: {}]   ;;  %s1050_s5 = inlined_call_operand.vmem [shape: f32[1,96], index: 5, kind: input, shape index: {}]   ;;  %s1051_s7 = inlined_call_operand.<no memory space> [shape: f32[1,1], index: 7, kind: input, shape index: {}]   ;;  %s1052_s6 = inlined_call_operand.vmem [shape: f32[1,32], index: 6, kind: input, shape index: {}]   ;;  %s1053_s8 = inlined_call_operand.vmem [shape: f32[1,1,64], index: 8, kind: output, shape index: {}]  }
   0x1   :  { %v594_v0 = vld [vmem:[%s1045_s2 + $0x8] sm:$0xff]  ;;  %v593_v2 = vld [vmem:[%s1045_s2] sm:$0xff]  ;;  %v591_v7 = vld [vmem:[%s1048_s0 + $0x10] sm:$0xff] }
   0x2   :  { %v596_v1 = vld [vmem:[%s1046_s3 + $0x8] sm:$0xff]  ;;  %101 = vmatpush.bf16.msra.mxu0 %v594_v0  ;;  %597 = vmatpush.bf16.msra.mxu3 %v594_v0  ;;  %v595_v3 = vld [vmem:[%s1046_s3] sm:$0xff]  ;;  %v592_v10 = vld [vmem:[%s1048_s0 + $0x18] sm:$0xff] }
   0x3   :  { %154 = vmatpush.bf16.msra.mxu1 %v596_v1  ;;  %v719_v4 = vld [vmem:[%s1047_s1] sm:$0xff]  ;;  %v724_v5 = vld [vmem:[%s1047_s1 + $0x8] sm:$0xff] }
   0x4   :  { %v589_v6 = vld [vmem:[%s1048_s0] sm:$0xff]  ;;  %v124_v8 = vpack.c.bf16 %v724_v5, %v719_v4  ;;  %v590_v9 = vld [vmem:[%s1048_s0 + $0x8] sm:$0xff] }
   0x5   :  { %v606_v12 = vld [vmem:[%s1050_s5] ss:$0 sm:$0xff]  ;;  %s657_s5 = smov 96  }
   0x6   :  { %102 = vmatpush.bf16.msra.mxu0 %v593_v2  ;;  %598 = vmatpush.bf16.msra.mxu3 %v593_v2  ;;  %v605_v22 = vld [vmem:[%s1049_s4] ss:$0 sm:$0xff]  ;;  %s656_s4 = smov 32  }
   0x7   :  { %155 = vmatpush.bf16.msra.mxu1 %v595_v3 }
   0x9   :  { %559 = vmatmul.msk.bf16.vlgmr.msra.gmra.mxu0 %vm82_vm0, %v589_v6  ;;  %561 = vmatmul.msk.bf16.vlgmr.msra.gmra.mxu3 %vm82_vm0, %v591_v7 }
   0xa   :  { %571 = vmatmul.msk.bf16.vlgmr.msra.gmra.mxu1 %vm82_vm0, %v124_v8 }
  0x19   :  { %560 = vmatmul.msk.bf16.gmra.mxu0 %vm82_vm0, %v590_v9  ;;  %562 = vmatmul.msk.bf16.gmra.mxu3 %vm82_vm0, %v592_v10 }
  0x86   :  { %v104_v16 = vpop.f32.mrf.mxu0 }
  0x87   :  { %v157_v11 = vpop.f32.mrf.mxu1  ;;  %v759_v28 = vadd.f32 %v605_v22, %v104_v16 }
  0x88   :  { %v158_v15 = vadd.f32 %v606_v12, %v157_v11 }
  0x8a   :  { %v162_v33 = vadd.f32 %v158_v15, %v759_v28 }
  0x8c   :  { %v114_v17 = vpop.f32.mrf.mxu3  ;;  %v572_v39 = vmul.f32 -1.442695, %v162_v33 }
  0x8d   :  { %v762_v30 = vadd.f32 %v605_v22, %v114_v17 }
  0x8e   :  { %v106_v18 = vpop.f32.mrf.mxu0 }
  0x8f   :  { %v159_v13 = vpop.f32.mrf.mxu1  ;;  %v166_v35 = vadd.f32 %v158_v15, %v762_v30  ;;  %v770_v40 = vadd.f32 %v605_v22, %v106_v18 }
  0x90   :  { %v160_v14 = vadd.f32 %v606_v12, %v159_v13 }
  0x91   :  { %v576_v41 = vmul.f32 -1.442695, %v166_v35 }
  0x92   :  { %326 = vrot.lane.b32.xlu0 %v160_v14, %s655_s24  ;;  %v163_v43 = vadd.f32 %v160_v14, %v770_v40 }
  0x94   :  { %v116_v19 = vpop.f32.mrf.mxu3  ;;  %v573_v49 = vmul.f32 -1.442695, %v163_v43 }
  0x95   :  { %v753_v25 = vadd.f32 %v605_v22, %v116_v19 }
  0x96   :  { %v109_v20 = vpop.f32.mrf.mxu0 }
  0x97   :  { %v167_v29 = vadd.f32 %v160_v14, %v753_v25  ;;  %v774_v44 = vadd.f32 %v605_v22, %v109_v20 }
  0x99   :  { %v577_v34 = vmul.f32 -1.442695, %v167_v29  ;;  %v164_v50 = vadd.f32 %v158_v15, %v774_v44 }
  0x9a   :  { %324 = vrot.lane.b32.xlu0 %v158_v15, %s655_s24 }
  0x9b   :  { %607 = vpow2.f32 %v577_v34  ;;  %v574_v56 = vmul.f32 -1.442695, %v164_v50 }
  0x9c   :  { %v119_v21 = vpop.f32.mrf.mxu3 }
  0x9d   :  { %v768_v37 = vadd.f32 %v605_v22, %v119_v21 }
  0x9e   :  { %v111_v23 = vpop.f32.mrf.mxu0 }
  0x9f   :  { %v755_v26 = vadd.f32 %v605_v22, %v111_v23  ;;  %v168_v42 = vadd.f32 %v158_v15, %v768_v37 }
  0xa1   :  { %v165_v31 = vadd.f32 %v160_v14, %v755_v26  ;;  %v608_v45 = vpop.eup %607  ;;  %v578_v46 = vmul.f32 -1.442695, %v168_v42 }
  0xa2   :  { %v777_v51 = vadd.f32 1.0, %v608_v45 }
  0xa3   :  { %v575_v36 = vmul.f32 -1.442695, %v165_v31 }
  0xa4   :  { %v121_v24 = vpop.f32.mrf.mxu3  ;;  %vm282_vm1 = vweird.f32 %v777_v51  ;;  %v286_v29 = vand.u32 2147483647, %v777_v51  ;;  %v288_v34 = vand.u32 2147483648, %v777_v51 }
  0xa5   :  { %v757_v27 = vadd.f32 %v605_v22, %v121_v24  ;;  %609 = vpow2.f32 %v575_v36 }
  0xa6   :  { %vm869_vm11 = vcmp.eq.f32.partialorder %v286_v29, 8.507059e+37 }
  0xa7   :  { %v169_v32 = vadd.f32 %v160_v14, %v757_v27 }
  0xa9   :  { %v579_v38 = vmul.f32 -1.442695, %v169_v32 }
  0xab   :  { %611 = vpow2.f32 %v579_v38  ;;  %v610_v47 = vpop.eup %609 }
  0xac   :  { %613 = vpow2.f32 %v572_v39  ;;  %v779_v53 = vadd.f32 1.0, %v610_v47 }
  0xad   :  { %615 = vpow2.f32 %v576_v41 }
  0xae   :  { %617 = vpow2.f32 %v578_v46  ;;  %vm252_vm7 = vweird.f32 %v779_v53  ;;  %v258_v43 = vand.u32 2147483648, %v779_v53 }
  0xaf   :  { %619 = vpow2.f32 %v573_v49 }
  0xb0   :  { %621 = vrcp.f32 %v777_v51 }
  0xb1   :  { %v612_v48 = vpop.eup %611  ;;  %623 = vrcp.f32 %v779_v53 }
  0xb2   :  { %v614_v52 = vpop.eup %613  ;;  %v781_v55 = vadd.f32 1.0, %v612_v48  ;;  %v256_v48 = vand.u32 2147483647, %v779_v53 }
  0xb3   :  { %v616_v54 = vpop.eup %615  ;;  %v783_v57 = vadd.f32 1.0, %v614_v52 }
  0xb4   :  { %v786_v58 = vadd.f32 1.0, %v616_v54  ;;  %625 = vrcp.f32 %v781_v55  ;;  %v618_v59 = vpop.eup %617  ;;  %v318_v41 = vand.u32 2147483648, %v781_v55  ;;  %vm312_vm8 = vweird.f32 %v781_v55 }
  0xb5   :  { %627 = vpow2.f32 %v574_v56  ;;  %v620_v60 = vpop.eup %619  ;;  %v794_v62 = vadd.f32 1.0, %v618_v59  ;;  %v213_v23 = vand.u32 2147483648, %v783_v57  ;;  %vm207_vm5 = vweird.f32 %v783_v57 }
  0xb6   :  { %629 = vrcp.f32 %v783_v57  ;;  %v792_v61 = vpop.eup %621  ;;  %v807_v7 = vadd.f32 1.0, %v620_v60  ;;  %v316_v46 = vand.u32 2147483647, %v781_v55  ;;  %v319_v59 = vor.u32 1.1754944e-38, %v318_v41 }
  0xb7   :  { %631 = vrcp.f32 %v786_v58  ;;  %v796_v63 = vpop.eup %623  ;;  %v278_v3 = vmul.f32 %v792_v61, %v777_v51  ;;  %vm283_vm2 = vweird.f32 %v792_v61  ;;  %v289_v60 = vor.u32 1.1754944e-38, %v288_v34 }
  0xb8   :  { %633 = vrcp.f32 %v794_v62  ;;  %v248_v9 = vmul.f32 %v796_v63, %v779_v53  ;;  %vm253_vm3 = vweird.f32 %v796_v63  ;;  %vm848_vm6 = vmor %vm282_vm1, %vm283_vm2  ;;  %vm317_vm14 = vcmp.eq.f32.partialorder %v316_v46, 8.507059e+37 }
  0xb9   :  { %v279_v12 = vsub.f32 1.0, %v278_v3  ;;  %635 = vrcp.f32 %v807_v7  ;;  %vm858_vm9 = vmor %vm252_vm7, %vm253_vm3  ;;  %vm257_vm15 = vcmp.eq.f32.partialorder %v256_v48, 8.507059e+37  ;;  %vm267_vm2 = vweird.f32 %v786_v58 }
  0xba   :  { %v798_v0 = vpop.eup %625  ;;  %v249_v15 = vsub.f32 1.0, %v248_v9  ;;  %v271_v29 = vand.u32 2147483647, %v786_v58  ;;  %v228_v47 = vand.u32 2147483648, %v807_v7 }
  0xbb   :  { %v628_v1 = vpop.eup %627  ;;  %v308_v8 = vmul.f32 %v798_v0, %v781_v55  ;;  %v280_v18 = vmul.f32 %v792_v61, %v279_v12  ;;  %vm313_vm4 = vweird.f32 %v798_v0 }
  0xbc   :  { %v800_v2 = vpop.eup %629  ;;  %v813_v10 = vadd.f32 1.0, %v628_v1  ;;  %v250_v21 = vmul.f32 %v796_v63, %v249_v15  ;;  %vm865_vm10 = vmor %vm312_vm8, %vm313_vm4  ;;  %v259_v1 = vor.u32 1.1754944e-38, %v258_v43  ;;  %vm297_vm4 = vweird.f32 %v794_v62 }
  0xbd   :  { %v805_v6 = vpop.eup %631  ;;  %v203_v11 = vmul.f32 %v800_v2, %v783_v57  ;;  %v309_v14 = vsub.f32 1.0, %v308_v8  ;;  %v281_v33 = vadd.f32 %v792_v61, %v280_v18  ;;  %vm208_vm13 = vweird.f32 %v800_v2 }
  0xbe   :  { %v263_v13 = vmul.f32 %v805_v6, %v786_v58  ;;  %v820_v16 = vpop.eup %633  ;;  %637 = vrcp.f32 %v813_v10  ;;  %v251_v38 = vadd.f32 %v796_v63, %v250_v21  ;;  %vm268_vm12 = vweird.f32 %v805_v6  ;;  %vm912_vm3 = vmor %vm207_vm5, %vm208_vm13 }
  0xbf   :  { %v204_v17 = vsub.f32 1.0, %v203_v11  ;;  %v310_v20 = vmul.f32 %v798_v0, %v309_v14  ;;  %v293_v22 = vmul.f32 %v820_v16, %v794_v62  ;;  %v829_v24 = vpop.eup %635  ;;  %v285_v54 = vsel %vm848_vm6, %v792_v61, %v281_v33  ;;  %vm923_vm6 = vmor %vm267_vm2, %vm268_vm12 }
  0xc0   :  { %v264_v19 = vsub.f32 1.0, %v263_v13  ;;  %v218_v45 = vmul.f32 %v829_v24, %v807_v7  ;;  %v255_v55 = vsel %vm858_vm9, %v796_v63, %v251_v38  ;;  %v893_v61 = vsel %vm869_vm11, %v289_v60, %v285_v54 }
  0xc1   :  { %v205_v31 = vmul.f32 %v800_v2, %v204_v17  ;;  %v311_v36 = vadd.f32 %v798_v0, %v310_v20  ;;  %v294_v39 = vsub.f32 1.0, %v293_v22  ;;  %v895_v63 = vsel %vm257_vm15, %v259_v1, %v255_v55 }
  0xc2   :  { %v265_v35 = vmul.f32 %v805_v6, %v264_v19  ;;  %v219_v9 = vsub.f32 1.0, %v218_v45  ;;  %vm298_vm1 = vweird.f32 %v820_v16  ;;  %v303_v17 = vand.u32 2147483648, %v794_v62 }
  0xc3   :  { %v206_v52 = vadd.f32 %v800_v2, %v205_v31  ;;  %v315_v53 = vsel %vm865_vm10, %v798_v0, %v311_v36  ;;  %v295_v56 = vmul.f32 %v820_v16, %v294_v39  ;;  %v273_v18 = vand.u32 2147483648, %v786_v58  ;;  %vm931_vm5 = vmor %vm297_vm4, %vm298_vm1 }
  0xc4   :  { %v835_v32 = vpop.eup %637  ;;  %v266_v3 = vadd.f32 %v805_v6, %v265_v35  ;;  %v889_v11 = vsel %vm317_vm14, %v319_v59, %v315_v53  ;;  %v211_v20 = vand.u32 2147483647, %v783_v57  ;;  %v301_v21 = vand.u32 2147483647, %v794_v62 }
  0xc5   :  { %v233_v49 = vmul.f32 %v835_v32, %v813_v10  ;;  %v296_v15 = vadd.f32 %v820_v16, %v295_v56  ;;  %v210_v62 = vsel %vm912_vm3, %v800_v2, %v206_v52  ;;  %v220_v33 = vmul.f32 %v829_v24, %v219_v9 }
  0xc6   :  { %v270_v58 = vsel %vm923_vm6, %v805_v6, %v266_v3  ;;  %v214_v35 = vor.u32 1.1754944e-38, %v213_v23  ;;  %v304_v38 = vor.u32 1.1754944e-38, %v303_v17  ;;  %v274_v39 = vor.u32 1.1754944e-38, %v273_v18 }
  0xc7   :  { %v234_v8 = vsub.f32 1.0, %v233_v49  ;;  %v300_v34 = vsel %vm931_vm5, %v820_v16, %v296_v15  ;;  %vm212_vm7 = vcmp.eq.f32.partialorder %v211_v20, 8.507059e+37  ;;  %vm302_vm8 = vcmp.eq.f32.partialorder %v301_v21, 8.507059e+37 }
  0xc8   :  { %vm272_vm9 = vcmp.eq.f32.partialorder %v271_v29, 8.507059e+37  ;;  %v948_v2 = vsel %vm212_vm7, %v214_v35, %v210_v62  ;;  %vm223_vm10 = vweird.f32 %v829_v24  ;;  %v951_v16 = vsel %vm302_vm8, %v304_v38, %v300_v34 }
  0xc9   :  { %v235_v36 = vmul.f32 %v835_v32, %v234_v8  ;;  %v953_v42 = vsel %vm272_vm9, %v274_v39, %v270_v58  ;;  %vm238_vm11 = vweird.f32 %v835_v32  ;;  %v221_v57 = vadd.f32 %v829_v24, %v220_v33 }
  0xca   :  { %v243_v46 = vand.u32 2147483648, %v813_v10  ;;  %vm222_vm12 = vweird.f32 %v807_v7  ;;  %vm237_vm13 = vweird.f32 %v813_v10  ;;  %v241_v48 = vand.u32 2147483647, %v813_v10 }
  0xcb   :  { %v236_v45 = vadd.f32 %v835_v32, %v235_v36  ;;  %vm224_vm14 = vmor %vm222_vm12, %vm223_vm10  ;;  %v226_v49 = vand.u32 2147483647, %v807_v7  ;;  %v229_v53 = vor.u32 1.1754944e-38, %v228_v47  ;;  %v391_v19 = vsub.f32 1.0, %v893_v61 }
  0xcc   :  { %vm239_vm15 = vmor %vm237_vm13, %vm238_vm11  ;;  %v225_v51 = vsel %vm224_vm14, %v829_v24, %v221_v57  ;;  %v244_v52 = vor.u32 1.1754944e-38, %v243_v46  ;;  %vm242_vm1 = vcmp.eq.f32.partialorder %v241_v48, 8.507059e+37  ;;  %v393_v29 = vsub.f32 1.0, %v889_v11 }
  0xcd   :  { %v240_v50 = vsel %vm239_vm15, %v835_v32, %v236_v45  ;;  %vm227_vm2 = vcmp.eq.f32.partialorder %v226_v49, 8.507059e+37  ;;  %v392_v36 = vsub.f32 1.0, %v951_v16  ;;  %v390_v46 = vsub.f32 1.0, %v953_v42 }
  0xce   :  { %v976_v54 = vsel %vm242_vm1, %v244_v52, %v240_v50  ;;  %v978_v10 = vsel %vm227_vm2, %v229_v53, %v225_v51  ;;  %v386_v53 = vsub.f32 1.0, %v948_v2  ;;  %vm529_vm3 = vcmask 516096  }
  0xcf   :  { %v388_v35 = vsub.f32 1.0, %v976_v54 }
 0x104   :  { %v887_v0 = vpop.permute.xlu0 %326 }
 0x105   :  { %v337_v12 = vmul.f32 %v887_v0, %v889_v11  ;;  %v335_v13 = vmul.f32 %v887_v0, %v893_v61  ;;  %v333_v14 = vmul.f32 %v887_v0, %v895_v63  ;;  %v331_v7 = vmul.f32 %v887_v0, %v978_v10 }
 0x107   :  { %360 = vrot.lane.b32.xlu1 %v337_v12, %s655_s24  ;;  %356 = vrot.lane.b32.xlu2 %v335_v13, %s655_s24 }
 0x108   :  { %352 = vrot.lane.b32.xlu0 %v333_v14, %s655_s24 }
 0x10c   :  { %v325_v41 = vpop.permute.xlu0 %324 }
 0x10d   :  { %v336_v6 = vmul.f32 %v325_v41, %v951_v16  ;;  %v334_v23 = vmul.f32 %v325_v41, %v953_v42  ;;  %v330_v43 = vmul.f32 %v325_v41, %v948_v2  ;;  %v332_v55 = vmul.f32 %v325_v41, %v976_v54 }
 0x10f   :  { %358 = vrot.lane.b32.xlu1 %v336_v6, %s655_s24  ;;  %354 = vrot.lane.b32.xlu2 %v334_v23, %s655_s24 }
 0x110   :  { %346 = vrot.lane.b32.xlu0 %v330_v43, %s655_s24 }
 0x117   :  { %350 = vrot.lane.b32.xlu1 %v332_v55, %s655_s24  ;;  %348 = vrot.lane.b32.xlu2 %v331_v7, %s655_s24  ;;  %v387_v55 = vsub.f32 1.0, %v978_v10 }
 0x11f   :  { %438 = vrot.lane.b32.xlu2 %v724_v5, %s656_s4 }
 0x161   :  { %v357_v24 = vpop.permute.xlu2 %356 }
 0x162   :  { %v375_v32 = vadd.f32 %v357_v24, %v753_v25 }
 0x164   :  { %639 = vtanh.f32 %v375_v32 }
 0x169   :  { %v355_v5 = vpop.permute.xlu2 %354 }
 0x16a   :  { %v640_v56 = vpop.eup %639  ;;  %v374_v0 = vadd.f32 %v355_v5, %v762_v30 }
 0x16b   :  { %412 = vrot.lane.b32.xlu2 %v640_v56, %s657_s5 }
 0x179   :  { %v361_v59 = vpop.permute.xlu1 %360 }
 0x17a   :  { %v377_v60 = vadd.f32 %v361_v59, %v757_v27  ;;  %v353_v9 = vpop.permute.xlu0 %352 }
 0x17b   :  { %v373_v25 = vadd.f32 %v353_v9, %v755_v26 }
 0x17c   :  { %641 = vtanh.f32 %v377_v60 }
 0x181   :  { %v359_v1 = vpop.permute.xlu1 %358 }
 0x182   :  { %v642_v3 = vpop.eup %641  ;;  %v376_v8 = vadd.f32 %v359_v1, %v768_v37  ;;  %v347_v27 = vpop.permute.xlu0 %346  ;;  %v13_v1 = vstv %s1051_s7 }
 0x183   :  { %416 = vrot.lane.b32.xlu1 %v642_v3, %s657_s5  ;;  %v349_v37 = vpop.permute.xlu2 %348  ;;  %v370_v15 = vadd.f32 %v347_v27, %v759_v28  ;;  %v658_v3 = vmov 0   ;;  %14 = vst [vmem:[#allocation2] sm:$0x1] %v13_v1 }
 0x184   :  { %643 = vtanh.f32 %v376_v8  ;;  %v371_v26 = vadd.f32 %v349_v37, %v770_v40  ;;  %603 = vset.pattern.permute.xlu1 %v658_v3  ;;  %604 = vset.pattern.permute.xlu0 %v658_v3 }
 0x185   :  { %645 = vtanh.f32 %v373_v25 }
 0x189   :  { %v351_v12 = vpop.permute.xlu1 %350 }
 0x18a   :  { %v644_v13 = vpop.eup %643  ;;  %v372_v14 = vadd.f32 %v351_v12, %v774_v44  ;;  %v459_v8 = vld [vmem:[#allocation2] sm:$0x1] }
 0x18b   :  { %436 = vrot.lane.b32.xlu1 %v719_v4, %s656_s4  ;;  %414 = vrot.lane.b32.xlu0 %v644_v13, %s657_s5  ;;  %v646_v17 = vpop.eup %645  ;;  %v439_v28 = vpop.permute.xlu2 %438  ;;  %v458_v13 = vld [vmem:[%s1052_s6] sm:$0x1] }
 0x18c   :  { %647 = vtanh.f32 %v372_v14  ;;  %v447_v20 = vmul.f32 %v439_v28, %v893_v61  ;;  %v449_v33 = vmul.f32 %v439_v28, %v889_v11  ;;  %v389_v11 = vsub.f32 1.0, %v895_v63 }
 0x18d   :  { %649 = vtanh.f32 %v374_v0  ;;  %v445_v48 = vmul.f32 %v439_v28, %v895_v63  ;;  %v443_v63 = vmul.f32 %v439_v28, %v978_v10 }
 0x18e   :  { %651 = vtanh.f32 %v370_v15 }
 0x18f   :  { %653 = vtanh.f32 %v371_v26 }
 0x192   :  { %v648_v18 = vpop.eup %647 }
 0x193   :  { %v650_v30 = vpop.eup %649  ;;  %408 = vrot.lane.b32.xlu1 %v646_v17, %s657_s5  ;;  %406 = vrot.lane.b32.xlu2 %v648_v18, %s657_s5 }
 0x194   :  { %410 = vrot.lane.b32.xlu0 %v650_v30, %s657_s5  ;;  %v652_v4 = vpop.eup %651 }
 0x195   :  { %v654_v44 = vpop.eup %653 }
 0x19b   :  { %402 = vrot.lane.b32.xlu1 %v652_v4, %s657_s5 }
 0x19c   :  { %404 = vrot.lane.b32.xlu0 %v654_v44, %s657_s5 }
 0x1c5   :  { %v413_v40 = vpop.permute.xlu2 %412 }
 0x1c6   :  { %v431_v21 = vmul.f32 %v413_v40, %v391_v19 }
 0x1c8   :  { %v455_v22 = vadd.f32 %v447_v20, %v431_v21 }
 0x1ca   :  { %484 = vrot.lane.b32.xlu1 %v455_v22, %s657_s5 }
 0x1ed   :  { %v407_v58 = vpop.permute.xlu2 %406 }
 0x1ee   :  { %v428_v39 = vmul.f32 %v407_v58, %v388_v35 }
 0x1f5   :  { %v417_v31 = vpop.permute.xlu1 %416 }
 0x1f6   :  { %v433_v62 = vmul.f32 %v417_v31, %v393_v29 }
 0x1f8   :  { %v457_v34 = vadd.f32 %v449_v33, %v433_v62 }
 0x1fa   :  { %488 = vrot.lane.b32.xlu2 %v457_v34, %s657_s5 }
 0x1fd   :  { %v437_v38 = vpop.permute.xlu1 %436  ;;  %v415_v61 = vpop.permute.xlu0 %414 }
 0x1fe   :  { %v444_v41 = vmul.f32 %v437_v38, %v976_v54  ;;  %v448_v57 = vmul.f32 %v437_v38, %v951_v16  ;;  %v432_v6 = vmul.f32 %v415_v61, %v392_v36  ;;  %v446_v50 = vmul.f32 %v437_v38, %v953_v42 }
 0x1ff   :  { %v442_v7 = vmul.f32 %v437_v38, %v948_v2 }
 0x200   :  { %v456_v23 = vadd.f32 %v448_v57, %v432_v6  ;;  %v452_v43 = vadd.f32 %v444_v41, %v428_v39 }
 0x202   :  { %478 = vrot.lane.b32.xlu1 %v452_v43, %s657_s5  ;;  %486 = vrot.lane.b32.xlu0 %v456_v23, %s657_s5 }
 0x205   :  { %v409_v45 = vpop.permute.xlu1 %408 }
 0x206   :  { %v429_v47 = vmul.f32 %v409_v45, %v389_v11  ;;  %v411_v49 = vpop.permute.xlu0 %410 }
 0x207   :  { %v430_v51 = vmul.f32 %v411_v49, %v390_v46 }
 0x208   :  { %v453_v16 = vadd.f32 %v445_v48, %v429_v47 }
 0x209   :  { %v454_v52 = vadd.f32 %v446_v50, %v430_v51 }
 0x20a   :  { %480 = vrot.lane.b32.xlu0 %v453_v16, %s657_s5  ;;  %462 = vperm.xlu1 %603, %v459_v8  }
 0x20b   :  { %482 = vrot.lane.b32.xlu2 %v454_v52, %s657_s5 }
 0x20d   :  { %v403_v54 = vpop.permute.xlu1 %402 }
 0x20e   :  { %v426_v24 = vmul.f32 %v403_v54, %v386_v53  ;;  %v405_v32 = vpop.permute.xlu0 %404 }
 0x20f   :  { %v427_v56 = vmul.f32 %v405_v32, %v387_v55 }
 0x210   :  { %v450_v42 = vadd.f32 %v442_v7, %v426_v24 }
 0x211   :  { %v451_v59 = vadd.f32 %v443_v63, %v427_v56 }
 0x212   :  { %474 = vrot.lane.b32.xlu0 %v450_v42, %s657_s5 }
 0x213   :  { %476 = vrot.lane.b32.xlu2 %v451_v59, %s657_s5 }
 0x23c   :  { %v485_v10 = vpop.permute.xlu1 %484 }
 0x254   :  { %v489_v60 = vpop.permute.xlu2 %488 }
 0x255   :  { %580 = vmatpush.xpose.msk.msra.mxu2 %vm82_vm0, %v489_v60 }
 0x265   :  { %v483_v9 = vpop.permute.xlu2 %482 }
 0x26d   :  { %v477_v0 = vpop.permute.xlu2 %476 }
 0x274   :  { %v487_v2 = vpop.permute.xlu0 %486  ;;  %v479_v25 = vpop.permute.xlu1 %478 }
 0x275   :  { %581 = vmatpush.xpose.msk.msra.mxu2 %vm82_vm0, %v487_v2 }
 0x279   :  { %582 = vmatpush.xpose.msk.msra.mxu2 %vm82_vm0, %v485_v10 }
 0x27c   :  { %v481_v5 = vpop.permute.xlu0 %480  ;;  %v463_v14 = vpop.permute.xlu1 %462 }
 0x27d   :  { %583 = vmatpush.xpose.msk.msra.mxu2 %vm82_vm0, %v483_v9  ;;  %v465_v27 = vperm.slane %v463_v14, 0 }
 0x281   :  { %584 = vmatpush.xpose.msk.msra.mxu2 %vm82_vm0, %v481_v5 }
 0x284   :  { %v475_v12 = vpop.permute.xlu0 %474 }
 0x285   :  { %585 = vmatpush.xpose.msk.msra.mxu2 %vm82_vm0, %v479_v25 }
 0x289   :  { %586 = vmatpush.xpose.msk.msra.mxu2 %vm82_vm0, %v477_v0 }
 0x28d   :  { %587 = vmatpush.xpose.msk.msra.mxu2 %vm82_vm0, %v475_v12 }
 0x290   :  { %588 = vmatmul.msk.f32.vlgmr.msra.gmra.mxu2 %vm82_vm0, %v458_v13 }
 0x313   :  { %v526_v37 = vpop.f32.mrf.mxu2 }
 0x314   :  { %v527_v15 = vadd.f32 %v526_v37, %v465_v27 }
 0x316   :  { %530 = vst.msk [vmem:[%s1053_s8] sm:$0x1] %vm529_vm3, %v527_v15 }

// kernel: index_gru_forward.2
= control target key start
LH: loop header
LB: loop body
LE: loop exit
PB: predicated region body
PF: predicated region fallthrough
CT: control target
= control target key end

     0   :  { %vm18_vm0 = vcmask 254976   ;;  %v673_v2 = vmov 0.0   ;;  %vm30_vm1 = vcmask 261120   ;;  %s674_s21 = smov 64   ;;  %s676_s24 = smov 32   ;;  %s820_s1 = inlined_call_operand.vmem [shape: f32[32,96], index: 1, kind: input, shape index: {}]   ;;  %s821_s2 = inlined_call_operand.vmem [shape: f32[1,96], index: 2, kind: input, shape index: {}]   ;;  %s822_s0 = inlined_call_operand.vmem [shape: f32[8,2,96], index: 0, kind: input, shape index: {}]   ;;  %s823_s3 = inlined_call_operand.vmem [shape: f32[8,2,32], index: 3, kind: output, shape index: {}]  }
   0x1   :  { %v23_v0 = vld [vmem:[%s820_s1 + $0x18] sm:$0xff]  ;;  %v22_v1 = vld [vmem:[%s820_s1 + $0x10] sm:$0xff]  ;;  %19 = vst.msk [vmem:[#allocation2] sm:$0x3] %vm18_vm0, %v673_v2  ;;  %v21_v3 = vld [vmem:[%s820_s1 + $0x8] sm:$0xff] }
   0x2   :  { %46 = vmatpush.msra.mxu0 %v23_v0  ;;  %118 = vmatpush.msra.mxu1 %v23_v0  ;;  %v20_v4 = vld [vmem:[%s820_s1] sm:$0xff] }
   0x3   :  { %187 = vmatpush.msra.mxu2 %v23_v0  ;;  %256 = vmatpush.msra.mxu3 %v23_v0  ;;  %v714_v6 = vld [vmem:[%s821_s2] ss:$0 sm:$0xff]  ;;  %s675_s2 = smov 96   ;;  %v592_v38 = vld [vmem:[%s822_s0 + $0x2] sm:$0x3] }
   0x4   :  { %47 = vmatpush.msra.mxu0 %v22_v1  ;;  %119 = vmatpush.msra.mxu1 %v22_v1  ;;  %v26_v9 = vld [vmem:[%s822_s0] sm:$0x3]  ;;  %v596_v2 = vld [vmem:[%s822_s0 + $0x4] sm:$0x3] }
   0x5   :  { %188 = vmatpush.msra.mxu2 %v22_v1  ;;  %257 = vmatpush.msra.mxu3 %v22_v1 }
   0x6   :  { %48 = vmatpush.msra.mxu0 %v21_v3  ;;  %120 = vmatpush.msra.mxu1 %v21_v3 }
   0x7   :  { %189 = vmatpush.msra.mxu2 %v21_v3  ;;  %258 = vmatpush.msra.mxu3 %v21_v3 }
   0x8   :  { %49 = vmatpush.msra.mxu0 %v20_v4  ;;  %v25_v5 = vld [vmem:[#allocation2] sm:$0x3]  ;;  %121 = vmatpush.msra.mxu1 %v20_v4 }
   0x9   :  { %590 = vmatmul.msk.f32.vlgmr.msra.gmra.mxu0 %vm30_vm1, %v25_v5  ;;  %190 = vmatpush.msra.mxu2 %v20_v4 }
   0xa   :  { %259 = vmatpush.msra.mxu3 %v20_v4  ;;  %325 = vmatpush.msrb.mxu0 %v23_v0 }
   0xb   :  { %394 = vmatpush.msrb.mxu1 %v23_v0  ;;  %463 = vmatpush.msrb.mxu2 %v23_v0 }
   0xc   :  { %326 = vmatpush.msrb.mxu0 %v22_v1  ;;  %532 = vmatpush.msrb.mxu3 %v23_v0 }
   0xd   :  { %395 = vmatpush.msrb.mxu1 %v22_v1  ;;  %464 = vmatpush.msrb.mxu2 %v22_v1 }
   0xe   :  { %327 = vmatpush.msrb.mxu0 %v21_v3  ;;  %533 = vmatpush.msrb.mxu3 %v22_v1 }
   0xf   :  { %396 = vmatpush.msrb.mxu1 %v21_v3  ;;  %465 = vmatpush.msrb.mxu2 %v21_v3 }
  0x10   :  { %328 = vmatpush.msrb.mxu0 %v20_v4  ;;  %534 = vmatpush.msrb.mxu3 %v21_v3 }
  0x11   :  { %397 = vmatpush.msrb.mxu1 %v20_v4  ;;  %466 = vmatpush.msrb.mxu2 %v20_v4 }
  0x12   :  { %535 = vmatpush.msrb.mxu3 %v20_v4 }
  0x86   :  { %v51_v7 = vpop.f32.mrf.mxu0 }
  0x87   :  { %v52_v8 = vadd.f32 %v714_v6, %v51_v7 }
  0x89   :  { %75 = vrot.lane.b32.xlu0 %v52_v8, %s674_s21  ;;  %v54_v10 = vadd.f32 %v52_v8, %v26_v9 }
  0x8b   :  { %v591_v11 = vmul.f32 -1.442695, %v54_v10 }
  0x8d   :  { %625 = vpow2.f32 %v591_v11 }
  0x93   :  { %v626_v12 = vpop.eup %625 }
  0x94   :  { %v58_v13 = vadd.f32 1.0, %v626_v12 }
  0x96   :  { %627 = vrcp.f32 %v58_v13  ;;  %v70_v19 = vand.u32 2147483648, %v58_v13  ;;  %vm64_vm3 = vweird.f32 %v58_v13  ;;  %v68_v20 = vand.u32 2147483647, %v58_v13 }
  0x98   :  { %v71_v22 = vor.u32 1.1754944e-38, %v70_v19  ;;  %vm69_vm5 = vcmp.eq.f32.partialorder %v68_v20, 8.507059e+37 }
  0x9c   :  { %v628_v14 = vpop.eup %627 }
  0x9d   :  { %v60_v15 = vmul.f32 %v628_v14, %v58_v13  ;;  %vm65_vm2 = vweird.f32 %v628_v14 }
  0x9e   :  { %vm66_vm4 = vmor %vm64_vm3, %vm65_vm2 }
  0x9f   :  { %v61_v16 = vsub.f32 1.0, %v60_v15 }
  0xa1   :  { %v62_v17 = vmul.f32 %v628_v14, %v61_v16 }
  0xa3   :  { %v63_v18 = vadd.f32 %v628_v14, %v62_v17 }
  0xa5   :  { %v67_v21 = vsel %vm66_vm4, %v628_v14, %v63_v18 }
  0xa6   :  { %v72_v24 = vsel %vm69_vm5, %v71_v22, %v67_v21 }
  0xa7   :  { %v85_v30 = vsub.f32 1.0, %v72_v24 }
  0xfb   :  { %v76_v23 = vpop.permute.xlu0 %75 }
  0xfc   :  { %v78_v25 = vmul.f32 %v76_v23, %v72_v24 }
  0xfe   :  { %80 = vrot.lane.b32.xlu0 %v78_v25, %s674_s21 }
 0x170   :  { %v81_v26 = vpop.permute.xlu0 %80 }
 0x171   :  { %v83_v27 = vadd.f32 %v81_v26, %v26_v9 }
 0x173   :  { %629 = vtanh.f32 %v83_v27 }
 0x179   :  { %v630_v28 = vpop.eup %629 }
 0x17a   :  { %87 = vrot.lane.b32.xlu1 %v630_v28, %s675_s2 }
 0x182   :  { %91 = vrot.lane.b32.xlu1 %v25_v5, %s676_s24 }
 0x1ec   :  { %v88_v29 = vpop.permute.xlu1 %87 }
 0x1ed   :  { %v90_v32 = vmul.f32 %v88_v29, %v85_v30 }
 0x1f4   :  { %v92_v31 = vpop.permute.xlu1 %91 }
 0x1f5   :  { %v94_v33 = vmul.f32 %v92_v31, %v72_v24  ;;  %v600_v31 = vld [vmem:[%s822_s0 + $0x6] sm:$0x3] }
 0x1f7   :  { %v95_v34 = vadd.f32 %v94_v33, %v90_v32 }
 0x1f9   :  { %97 = vrot.lane.b32.xlu2 %v95_v34, %s675_s2 }
 0x253   :  { %v98_v35 = vpop.permute.xlu2 %97 }
 0x254   :  { %101 = vst.msk [vmem:[%s823_s3] sm:$0x3] %vm18_vm0, %v98_v35  ;;  %593 = vmatmul.msk.f32.vlgmr.msra.gmra.mxu1 %vm30_vm1, %v98_v35 }
 0x2d1   :  { %v123_v36 = vpop.f32.mrf.mxu1 }
 0x2d2   :  { %v124_v37 = vadd.f32 %v714_v6, %v123_v36 }
 0x2d4   :  { %147 = vrot.lane.b32.xlu2 %v124_v37, %s674_s21  ;;  %v126_v39 = vadd.f32 %v592_v38, %v124_v37 }
 0x2d6   :  { %v594_v40 = vmul.f32 -1.442695, %v126_v39 }
 0x2d8   :  { %631 = vpow2.f32 %v594_v40 }
 0x2de   :  { %v632_v41 = vpop.eup %631 }
 0x2df   :  { %v130_v42 = vadd.f32 1.0, %v632_v41 }
 0x2e1   :  { %633 = vrcp.f32 %v130_v42  ;;  %v142_v48 = vand.u32 2147483648, %v130_v42  ;;  %vm136_vm7 = vweird.f32 %v130_v42  ;;  %v140_v49 = vand.u32 2147483647, %v130_v42 }
 0x2e3   :  { %v143_v51 = vor.u32 1.1754944e-38, %v142_v48  ;;  %vm141_vm9 = vcmp.eq.f32.partialorder %v140_v49, 8.507059e+37 }
 0x2e7   :  { %v634_v43 = vpop.eup %633 }
 0x2e8   :  { %v132_v44 = vmul.f32 %v634_v43, %v130_v42  ;;  %vm137_vm6 = vweird.f32 %v634_v43 }
 0x2e9   :  { %vm138_vm8 = vmor %vm136_vm7, %vm137_vm6 }
 0x2ea   :  { %v133_v45 = vsub.f32 1.0, %v132_v44 }
 0x2ec   :  { %v134_v46 = vmul.f32 %v634_v43, %v133_v45 }
 0x2ee   :  { %v135_v47 = vadd.f32 %v634_v43, %v134_v46 }
 0x2f0   :  { %v139_v50 = vsel %vm138_vm8, %v634_v43, %v135_v47 }
 0x2f1   :  { %v144_v53 = vsel %vm141_vm9, %v143_v51, %v139_v50 }
 0x2f2   :  { %v157_v58 = vsub.f32 1.0, %v144_v53  ;;  %v163_v60 = vmul.f32 %v144_v53, %v95_v34 }
 0x32e   :  { %v148_v52 = vpop.permute.xlu2 %147 }
 0x32f   :  { %v150_v54 = vmul.f32 %v148_v52, %v144_v53 }
 0x331   :  { %152 = vrot.lane.b32.xlu0 %v150_v54, %s674_s21 }
 0x3a3   :  { %v153_v55 = vpop.permute.xlu0 %152 }
 0x3a4   :  { %v155_v56 = vadd.f32 %v592_v38, %v153_v55 }
 0x3a6   :  { %635 = vtanh.f32 %v155_v56 }
 0x3ac   :  { %v636_v57 = vpop.eup %635 }
 0x3ad   :  { %159 = vrot.lane.b32.xlu1 %v636_v57, %s675_s2 }
 0x41f   :  { %v160_v59 = vpop.permute.xlu1 %159 }
 0x420   :  { %v162_v61 = vmul.f32 %v160_v59, %v157_v58  ;;  %v604_v59 = vld [vmem:[%s822_s0 + $0x8] sm:$0x3] }
 0x422   :  { %v164_v62 = vadd.f32 %v163_v60, %v162_v61 }
 0x424   :  { %166 = vrot.lane.b32.xlu2 %v164_v62, %s675_s2 }
 0x47e   :  { %v167_v63 = vpop.permute.xlu2 %166 }
 0x47f   :  { %595 = vst.msk [vmem:[%s823_s3 + $0x2] sm:$0x3] %vm18_vm0, %v167_v63  ;;  %597 = vmatmul.msk.f32.vlgmr.msra.gmra.mxu2 %vm30_vm1, %v167_v63 }
 0x502   :  { %v192_v0 = vpop.f32.mrf.mxu2 }
 0x503   :  { %v193_v1 = vadd.f32 %v714_v6, %v192_v0 }
 0x505   :  { %216 = vrot.lane.b32.xlu0 %v193_v1, %s674_s21  ;;  %v195_v3 = vadd.f32 %v596_v2, %v193_v1 }
 0x507   :  { %v598_v4 = vmul.f32 -1.442695, %v195_v3 }
 0x509   :  { %637 = vpow2.f32 %v598_v4 }
 0x50f   :  { %v638_v5 = vpop.eup %637 }
 0x510   :  { %v199_v7 = vadd.f32 1.0, %v638_v5 }
 0x512   :  { %639 = vrcp.f32 %v199_v7  ;;  %v211_v13 = vand.u32 2147483648, %v199_v7  ;;  %vm205_vm11 = vweird.f32 %v199_v7  ;;  %v209_v14 = vand.u32 2147483647, %v199_v7 }
 0x514   :  { %v212_v16 = vor.u32 1.1754944e-38, %v211_v13  ;;  %vm210_vm13 = vcmp.eq.f32.partialorder %v209_v14, 8.507059e+37 }
 0x518   :  { %v640_v8 = vpop.eup %639 }
 0x519   :  { %v201_v9 = vmul.f32 %v640_v8, %v199_v7  ;;  %vm206_vm10 = vweird.f32 %v640_v8 }
 0x51a   :  { %vm207_vm12 = vmor %vm205_vm11, %vm206_vm10 }
 0x51b   :  { %v202_v10 = vsub.f32 1.0, %v201_v9 }
 0x51d   :  { %v203_v11 = vmul.f32 %v640_v8, %v202_v10 }
 0x51f   :  { %v204_v12 = vadd.f32 %v640_v8, %v203_v11 }
 0x521   :  { %v208_v15 = vsel %vm207_vm12, %v640_v8, %v204_v12 }
 0x522   :  { %v213_v18 = vsel %vm210_vm13, %v212_v16, %v208_v15 }
 0x523   :  { %v226_v23 = vsub.f32 1.0, %v213_v18  ;;  %v232_v25 = vmul.f32 %v213_v18, %v164_v62 }
 0x577   :  { %v217_v17 = vpop.permute.xlu0 %216 }
 0x578   :  { %v219_v19 = vmul.f32 %v217_v17, %v213_v18 }
 0x57a   :  { %221 = vrot.lane.b32.xlu1 %v219_v19, %s674_s21 }
 0x5ec   :  { %v222_v20 = vpop.permute.xlu1 %221 }
 0x5ed   :  { %v224_v21 = vadd.f32 %v596_v2, %v222_v20 }
 0x5ef   :  { %641 = vtanh.f32 %v224_v21 }
 0x5f5   :  { %v642_v22 = vpop.eup %641 }
 0x5f6   :  { %228 = vrot.lane.b32.xlu2 %v642_v22, %s675_s2 }
 0x650   :  { %v229_v24 = vpop.permute.xlu2 %228 }
 0x651   :  { %v231_v26 = vmul.f32 %v229_v24, %v226_v23  ;;  %v608_v24 = vld [vmem:[%s822_s0 + $0xa] sm:$0x3] }
 0x653   :  { %v233_v27 = vadd.f32 %v232_v25, %v231_v26 }
 0x655   :  { %235 = vrot.lane.b32.xlu0 %v233_v27, %s675_s2 }
 0x6c7   :  { %v236_v28 = vpop.permute.xlu0 %235 }
 0x6c8   :  { %599 = vst.msk [vmem:[%s823_s3 + $0x4] sm:$0x3] %vm18_vm0, %v236_v28  ;;  %601 = vmatmul.msk.f32.vlgmr.msra.gmra.mxu3 %vm30_vm1, %v236_v28 }
 0x74b   :  { %v261_v29 = vpop.f32.mrf.mxu3 }
 0x74c   :  { %v262_v30 = vadd.f32 %v714_v6, %v261_v29 }
 0x74e   :  { %285 = vrot.lane.b32.xlu1 %v262_v30, %s674_s21  ;;  %v264_v32 = vadd.f32 %v600_v31, %v262_v30 }
 0x750   :  { %v602_v33 = vmul.f32 -1.442695, %v264_v32 }
 0x752   :  { %643 = vpow2.f32 %v602_v33 }
 0x758   :  { %v644_v34 = vpop.eup %643 }
 0x759   :  { %v268_v35 = vadd.f32 1.0, %v644_v34 }
 0x75b   :  { %645 = vrcp.f32 %v268_v35  ;;  %v280_v41 = vand.u32 2147483648, %v268_v35  ;;  %vm274_vm15 = vweird.f32 %v268_v35  ;;  %v278_v42 = vand.u32 2147483647, %v268_v35 }
 0x75d   :  { %v281_v44 = vor.u32 1.1754944e-38, %v280_v41  ;;  %vm279_vm3 = vcmp.eq.f32.partialorder %v278_v42, 8.507059e+37 }
 0x761   :  { %v646_v36 = vpop.eup %645 }
 0x762   :  { %v270_v37 = vmul.f32 %v646_v36, %v268_v35  ;;  %vm275_vm14 = vweird.f32 %v646_v36 }
 0x763   :  { %vm276_vm2 = vmor %vm274_vm15, %vm275_vm14 }
 0x764   :  { %v271_v38 = vsub.f32 1.0, %v270_v37 }
 0x766   :  { %v272_v39 = vmul.f32 %v646_v36, %v271_v38 }
 0x768   :  { %v273_v40 = vadd.f32 %v646_v36, %v272_v39 }
 0x76a   :  { %v277_v43 = vsel %vm276_vm2, %v646_v36, %v273_v40 }
 0x76b   :  { %v282_v46 = vsel %vm279_vm3, %v281_v44, %v277_v43 }
 0x76c   :  { %v295_v51 = vsub.f32 1.0, %v282_v46  ;;  %v301_v53 = vmul.f32 %v282_v46, %v233_v27 }
 0x7c0   :  { %v286_v45 = vpop.permute.xlu1 %285 }
 0x7c1   :  { %v288_v47 = vmul.f32 %v286_v45, %v282_v46 }
 0x7c3   :  { %290 = vrot.lane.b32.xlu2 %v288_v47, %s674_s21 }
 0x81d   :  { %v291_v48 = vpop.permute.xlu2 %290 }
 0x81e   :  { %v293_v49 = vadd.f32 %v600_v31, %v291_v48 }
 0x820   :  { %647 = vtanh.f32 %v293_v49 }
 0x826   :  { %v648_v50 = vpop.eup %647 }
 0x827   :  { %297 = vrot.lane.b32.xlu0 %v648_v50, %s675_s2 }
 0x899   :  { %v298_v52 = vpop.permute.xlu0 %297 }
 0x89a   :  { %v300_v54 = vmul.f32 %v298_v52, %v295_v51  ;;  %v612_v52 = vld [vmem:[%s822_s0 + $0xc] sm:$0x3] }
 0x89c   :  { %v302_v55 = vadd.f32 %v301_v53, %v300_v54 }
 0x89e   :  { %304 = vrot.lane.b32.xlu1 %v302_v55, %s675_s2 }
 0x910   :  { %v305_v56 = vpop.permute.xlu1 %304 }
 0x911   :  { %603 = vst.msk [vmem:[%s823_s3 + $0x6] sm:$0x3] %vm18_vm0, %v305_v56  ;;  %605 = vmatmul.msk.f32.vlgmr.msrb.gmra.mxu0 %vm30_vm1, %v305_v56 }
 0x98e   :  { %v330_v57 = vpop.f32.mrf.mxu0 }
 0x98f   :  { %v331_v58 = vadd.f32 %v714_v6, %v330_v57 }
 0x991   :  { %354 = vrot.lane.b32.xlu2 %v331_v58, %s674_s21  ;;  %v333_v60 = vadd.f32 %v604_v59, %v331_v58 }
 0x993   :  { %v606_v61 = vmul.f32 -1.442695, %v333_v60 }
 0x995   :  { %649 = vpow2.f32 %v606_v61 }
 0x99b   :  { %v650_v62 = vpop.eup %649 }
 0x99c   :  { %v337_v63 = vadd.f32 1.0, %v650_v62 }
 0x99e   :  { %651 = vrcp.f32 %v337_v63  ;;  %v349_v5 = vand.u32 2147483648, %v337_v63  ;;  %vm343_vm5 = vweird.f32 %v337_v63  ;;  %v347_v7 = vand.u32 2147483647, %v337_v63 }
 0x9a0   :  { %v350_v9 = vor.u32 1.1754944e-38, %v349_v5  ;;  %vm348_vm7 = vcmp.eq.f32.partialorder %v347_v7, 8.507059e+37 }
 0x9a4   :  { %v652_v0 = vpop.eup %651 }
 0x9a5   :  { %v339_v1 = vmul.f32 %v652_v0, %v337_v63  ;;  %vm344_vm4 = vweird.f32 %v652_v0 }
 0x9a6   :  { %vm345_vm6 = vmor %vm343_vm5, %vm344_vm4 }
 0x9a7   :  { %v340_v2 = vsub.f32 1.0, %v339_v1 }
 0x9a9   :  { %v341_v3 = vmul.f32 %v652_v0, %v340_v2 }
 0x9ab   :  { %v342_v4 = vadd.f32 %v652_v0, %v341_v3 }
 0x9ad   :  { %v346_v8 = vsel %vm345_vm6, %v652_v0, %v342_v4 }
 0x9ae   :  { %v351_v11 = vsel %vm348_vm7, %v350_v9, %v346_v8 }
 0x9af   :  { %v364_v16 = vsub.f32 1.0, %v351_v11  ;;  %v370_v18 = vmul.f32 %v351_v11, %v302_v55 }
 0x9eb   :  { %v355_v10 = vpop.permute.xlu2 %354 }
 0x9ec   :  { %v357_v12 = vmul.f32 %v355_v10, %v351_v11 }
 0x9ee   :  { %359 = vrot.lane.b32.xlu0 %v357_v12, %s674_s21 }
 0xa60   :  { %v360_v13 = vpop.permute.xlu0 %359 }
 0xa61   :  { %v362_v14 = vadd.f32 %v604_v59, %v360_v13 }
 0xa63   :  { %653 = vtanh.f32 %v362_v14 }
 0xa69   :  { %v654_v15 = vpop.eup %653 }
 0xa6a   :  { %366 = vrot.lane.b32.xlu1 %v654_v15, %s675_s2 }
 0xadc   :  { %v367_v17 = vpop.permute.xlu1 %366 }
 0xadd   :  { %v369_v19 = vmul.f32 %v367_v17, %v364_v16  ;;  %v616_v17 = vld [vmem:[%s822_s0 + $0xe] sm:$0x3] }
 0xadf   :  { %v371_v20 = vadd.f32 %v370_v18, %v369_v19 }
 0xae1   :  { %373 = vrot.lane.b32.xlu2 %v371_v20, %s675_s2 }
 0xb3b   :  { %v374_v21 = vpop.permute.xlu2 %373 }
 0xb3c   :  { %607 = vst.msk [vmem:[%s823_s3 + $0x8] sm:$0x3] %vm18_vm0, %v374_v21  ;;  %609 = vmatmul.msk.f32.vlgmr.msrb.gmra.mxu1 %vm30_vm1, %v374_v21 }
 0xbb9   :  { %v399_v22 = vpop.f32.mrf.mxu1 }
 0xbba   :  { %v400_v23 = vadd.f32 %v714_v6, %v399_v22 }
 0xbbc   :  { %423 = vrot.lane.b32.xlu0 %v400_v23, %s674_s21  ;;  %v402_v25 = vadd.f32 %v608_v24, %v400_v23 }
 0xbbe   :  { %v610_v26 = vmul.f32 -1.442695, %v402_v25 }
 0xbc0   :  { %655 = vpow2.f32 %v610_v26 }
 0xbc6   :  { %v656_v27 = vpop.eup %655 }
 0xbc7   :  { %v406_v28 = vadd.f32 1.0, %v656_v27 }
 0xbc9   :  { %657 = vrcp.f32 %v406_v28  ;;  %v418_v34 = vand.u32 2147483648, %v406_v28  ;;  %vm412_vm9 = vweird.f32 %v406_v28  ;;  %v416_v35 = vand.u32 2147483647, %v406_v28 }
 0xbcb   :  { %v419_v37 = vor.u32 1.1754944e-38, %v418_v34  ;;  %vm417_vm11 = vcmp.eq.f32.partialorder %v416_v35, 8.507059e+37 }
 0xbcf   :  { %v658_v29 = vpop.eup %657 }
 0xbd0   :  { %v408_v30 = vmul.f32 %v658_v29, %v406_v28  ;;  %vm413_vm8 = vweird.f32 %v658_v29 }
 0xbd1   :  { %vm414_vm10 = vmor %vm412_vm9, %vm413_vm8 }
 0xbd2   :  { %v409_v31 = vsub.f32 1.0, %v408_v30 }
 0xbd4   :  { %v410_v32 = vmul.f32 %v658_v29, %v409_v31 }
 0xbd6   :  { %v411_v33 = vadd.f32 %v658_v29, %v410_v32 }
 0xbd8   :  { %v415_v36 = vsel %vm414_vm10, %v658_v29, %v411_v33 }
 0xbd9   :  { %v420_v39 = vsel %vm417_vm11, %v419_v37, %v415_v36 }
 0xbda   :  { %v433_v44 = vsub.f32 1.0, %v420_v39  ;;  %v439_v46 = vmul.f32 %v420_v39, %v371_v20 }
 0xc2e   :  { %v424_v38 = vpop.permute.xlu0 %423 }
 0xc2f   :  { %v426_v40 = vmul.f32 %v424_v38, %v420_v39 }
 0xc31   :  { %428 = vrot.lane.b32.xlu1 %v426_v40, %s674_s21 }
 0xca3   :  { %v429_v41 = vpop.permute.xlu1 %428 }
 0xca4   :  { %v431_v42 = vadd.f32 %v608_v24, %v429_v41 }
 0xca6   :  { %659 = vtanh.f32 %v431_v42 }
 0xcac   :  { %v660_v43 = vpop.eup %659 }
 0xcad   :  { %435 = vrot.lane.b32.xlu2 %v660_v43, %s675_s2 }
 0xd07   :  { %v436_v45 = vpop.permute.xlu2 %435 }
 0xd08   :  { %v438_v47 = vmul.f32 %v436_v45, %v433_v44 }
 0xd0a   :  { %v440_v48 = vadd.f32 %v439_v46, %v438_v47 }
 0xd0c   :  { %442 = vrot.lane.b32.xlu0 %v440_v48, %s675_s2 }
 0xd7e   :  { %v443_v49 = vpop.permute.xlu0 %442 }
 0xd7f   :  { %611 = vst.msk [vmem:[%s823_s3 + $0xa] sm:$0x3] %vm18_vm0, %v443_v49  ;;  %613 = vmatmul.msk.f32.vlgmr.msrb.gmra.mxu2 %vm30_vm1, %v443_v49 }
 0xe02   :  { %v468_v50 = vpop.f32.mrf.mxu2 }
 0xe03   :  { %v469_v51 = vadd.f32 %v714_v6, %v468_v50 }
 0xe05   :  { %492 = vrot.lane.b32.xlu1 %v469_v51, %s674_s21  ;;  %v471_v53 = vadd.f32 %v612_v52, %v469_v51 }
 0xe07   :  { %v614_v54 = vmul.f32 -1.442695, %v471_v53 }
 0xe09   :  { %661 = vpow2.f32 %v614_v54 }
 0xe0f   :  { %v662_v55 = vpop.eup %661 }
 0xe10   :  { %v475_v56 = vadd.f32 1.0, %v662_v55 }
 0xe12   :  { %663 = vrcp.f32 %v475_v56  ;;  %v487_v62 = vand.u32 2147483648, %v475_v56  ;;  %vm481_vm13 = vweird.f32 %v475_v56  ;;  %v485_v63 = vand.u32 2147483647, %v475_v56 }
 0xe14   :  { %v488_v1 = vor.u32 1.1754944e-38, %v487_v62  ;;  %vm486_vm15 = vcmp.eq.f32.partialorder %v485_v63, 8.507059e+37 }
 0xe18   :  { %v664_v57 = vpop.eup %663 }
 0xe19   :  { %v477_v58 = vmul.f32 %v664_v57, %v475_v56  ;;  %vm482_vm12 = vweird.f32 %v664_v57 }
 0xe1a   :  { %vm483_vm14 = vmor %vm481_vm13, %vm482_vm12 }
 0xe1b   :  { %v478_v59 = vsub.f32 1.0, %v477_v58 }
 0xe1d   :  { %v479_v60 = vmul.f32 %v664_v57, %v478_v59 }
 0xe1f   :  { %v480_v61 = vadd.f32 %v664_v57, %v479_v60 }
 0xe21   :  { %v484_v0 = vsel %vm483_vm14, %v664_v57, %v480_v61 }
 0xe22   :  { %v489_v3 = vsel %vm486_vm15, %v488_v1, %v484_v0 }
 0xe23   :  { %v502_v9 = vsub.f32 1.0, %v489_v3  ;;  %v508_v11 = vmul.f32 %v489_v3, %v440_v48 }
 0xe77   :  { %v493_v2 = vpop.permute.xlu1 %492 }
 0xe78   :  { %v495_v4 = vmul.f32 %v493_v2, %v489_v3 }
 0xe7a   :  { %497 = vrot.lane.b32.xlu2 %v495_v4, %s674_s21 }
 0xed4   :  { %v498_v5 = vpop.permute.xlu2 %497 }
 0xed5   :  { %v500_v7 = vadd.f32 %v612_v52, %v498_v5 }
 0xed7   :  { %665 = vtanh.f32 %v500_v7 }
 0xedd   :  { %v666_v8 = vpop.eup %665 }
 0xede   :  { %504 = vrot.lane.b32.xlu0 %v666_v8, %s675_s2 }
 0xf50   :  { %v505_v10 = vpop.permute.xlu0 %504 }
 0xf51   :  { %v507_v12 = vmul.f32 %v505_v10, %v502_v9 }
 0xf53   :  { %v509_v13 = vadd.f32 %v508_v11, %v507_v12 }
 0xf55   :  { %511 = vrot.lane.b32.xlu1 %v509_v13, %s675_s2 }
 0xfc7   :  { %v512_v14 = vpop.permute.xlu1 %511 }
 0xfc8   :  { %615 = vst.msk [vmem:[%s823_s3 + $0xc] sm:$0x3] %vm18_vm0, %v512_v14  ;;  %617 = vmatmul.msk.f32.vlgmr.msrb.gmra.mxu3 %vm30_vm1, %v512_v14 }
0x104b   :  { %v537_v15 = vpop.f32.mrf.mxu3 }
0x104c   :  { %v538_v16 = vadd.f32 %v714_v6, %v537_v15 }
0x104e   :  { %561 = vrot.lane.b32.xlu2 %v538_v16, %s674_s21  ;;  %v540_v18 = vadd.f32 %v616_v17, %v538_v16 }
0x1050   :  { %v618_v19 = vmul.f32 -1.442695, %v540_v18 }
0x1052   :  { %667 = vpow2.f32 %v618_v19 }
0x1058   :  { %v668_v20 = vpop.eup %667 }
0x1059   :  { %v544_v21 = vadd.f32 1.0, %v668_v20 }
0x105b   :  { %669 = vrcp.f32 %v544_v21  ;;  %v556_v27 = vand.u32 2147483648, %v544_v21  ;;  %vm550_vm2 = vweird.f32 %v544_v21  ;;  %v554_v6 = vand.u32 2147483647, %v544_v21 }
0x105d   :  { %v557_v29 = vor.u32 1.1754944e-38, %v556_v27  ;;  %vm555_vm4 = vcmp.eq.f32.partialorder %v554_v6, 8.507059e+37 }
0x1061   :  { %v670_v22 = vpop.eup %669 }
0x1062   :  { %v546_v23 = vmul.f32 %v670_v22, %v544_v21  ;;  %vm551_vm1 = vweird.f32 %v670_v22 }
0x1063   :  { %vm552_vm3 = vmor %vm550_vm2, %vm551_vm1 }
0x1064   :  { %v547_v24 = vsub.f32 1.0, %v546_v23 }
0x1066   :  { %v548_v25 = vmul.f32 %v670_v22, %v547_v24 }
0x1068   :  { %v549_v26 = vadd.f32 %v670_v22, %v548_v25 }
0x106a   :  { %v553_v28 = vsel %vm552_vm3, %v670_v22, %v549_v26 }
0x106b   :  { %v558_v31 = vsel %vm555_vm4, %v557_v29, %v553_v28 }
0x106c   :  { %v571_v36 = vsub.f32 1.0, %v558_v31  ;;  %v577_v38 = vmul.f32 %v558_v31, %v509_v13 }
0x10a8   :  { %v562_v30 = vpop.permute.xlu2 %561 }
0x10a9   :  { %v564_v32 = vmul.f32 %v562_v30, %v558_v31 }
0x10ab   :  { %566 = vrot.lane.b32.xlu0 %v564_v32, %s674_s21 }
0x111d   :  { %v567_v33 = vpop.permute.xlu0 %566 }
0x111e   :  { %v569_v34 = vadd.f32 %v616_v17, %v567_v33 }
0x1120   :  { %671 = vtanh.f32 %v569_v34 }
0x1126   :  { %v672_v35 = vpop.eup %671 }
0x1127   :  { %573 = vrot.lane.b32.xlu1 %v672_v35, %s675_s2 }
0x1199   :  { %v574_v37 = vpop.permute.xlu1 %573 }
0x119a   :  { %v576_v39 = vmul.f32 %v574_v37, %v571_v36 }
0x119c   :  { %v578_v40 = vadd.f32 %v577_v38, %v576_v39 }
0x119e   :  { %580 = vrot.lane.b32.xlu2 %v578_v40, %s675_s2 }
0x11f8   :  { %v581_v41 = vpop.permute.xlu2 %580 }
0x11f9   :  { %619 = vst.msk [vmem:[%s823_s3 + $0xe] sm:$0x3] %vm18_vm0, %v581_v41 }
0x11fa   :  { %585 = vst.msk [vmem:[#allocation2] sm:$0x3] %vm18_vm0, %v581_v41 }

</bundles_post_ra>
